<compile_context>
chip_gen: v7x
topology: tpu7x:2x2x1
jax: 0.10.0
libtpu: 0.0.40
codegen_flags: <defaults>
</compile_context>

<pallas_src>
import functools

import numpy as np
import jax
import jax.numpy as jnp
from jax import lax
from jax.experimental import pallas as pl
from jax.experimental.pallas import tpu as pltpu


# ----------------------------------------------------------------------------
# Pallas kernel: one transformer layer for one (Bblk, S, D) batch block.
# Grid = (batch_blocks, layers); layer carry lives in the resident out_ref.
# ----------------------------------------------------------------------------
def _stack_kernel(h_ref, w_in_ref, w_out_ref, w1_ref, w2_ref, vec_ref, out_ref,
                  *, nhead, valid_len):
    layer = pl.program_id(1)

    # Layer 0 of each batch block: seed the carried activation from the input.
    @pl.when(layer == 0)
    def _():
        out_ref[...] = h_ref[...]

    x3 = out_ref[...]                                  # (Bb, S, D) f32 carry
    Bb, S, D = x3.shape
    hd = D // nhead
    ff = w1_ref.shape[-1]
    eps = jnp.float32(1e-5)

    x = x3.reshape(Bb * S, D)                          # row-flattened dense path

    # Packed per-layer vectors (biases / LayerNorm params): one (8, P) slab.
    vec = vec_ref[0]
    b_in = vec[0:1, :3 * D]                            # Q portion pre-scaled
    b_out = vec[1:2, :D]
    g1, be1 = vec[2:3, :D], vec[3:4, :D]
    b1 = vec[4:5, :ff]
    b2 = vec[5:6, :D]
    g2, be2 = vec[6:7, :D], vec[7:8, :D]

    # ---- QKV projection (weights pre-transposed on host, Q pre-scaled) ----
    qkv = jnp.dot(x.astype(jnp.bfloat16), w_in_ref[0],
                  preferred_element_type=jnp.float32) + b_in   # (Bb*S, 3D) f32
    q = qkv[:, 0 * D:1 * D].reshape(Bb, S, D).astype(jnp.bfloat16)
    k = qkv[:, 1 * D:2 * D].reshape(Bb, S, D).astype(jnp.bfloat16)
    v = qkv[:, 2 * D:3 * D].reshape(Bb, S, D).astype(jnp.bfloat16)

    if valid_len < S:
        # Only taken when S was padded past the batch's true max length; keeps
        # semantics identical to the unpadded (mask-free) PyTorch model.
        col = lax.broadcasted_iota(jnp.int32, (1, 1, S), 2)
        key_bias = jnp.where(col >= valid_len,
                             jnp.float32(-1e30), jnp.float32(0.0))
    else:
        key_bias = None

    w_out = w_out_ref[0]                               # (D, D) = torch W_out.T
    attn = jnp.zeros((Bb * S, D), jnp.float32)
    for hh in range(nhead):                            # static unroll over heads
        lo, hi = hh * hd, (hh + 1) * hd
        qh, kh, vh = q[:, :, lo:hi], k[:, :, lo:hi], v[:, :, lo:hi]
        s = jnp.einsum("bqd,bkd->bqk", qh, kh,
                       preferred_element_type=jnp.float32)     # (Bb, S, S) f32
        if key_bias is not None:
            s = s + key_bias
        s = s - jnp.max(s, axis=-1, keepdims=True)
        p = jnp.exp(s)
        p = p * pl.reciprocal(jnp.sum(p, axis=-1, keepdims=True), approx=True)
        oh = jnp.einsum("bqk,bkd->bqd", p.astype(jnp.bfloat16), vh,
                        preferred_element_type=jnp.float32)    # (Bb, S, hd)
        # Fold this head's slice of the output projection into the accumulator
        # (no per-head concatenate, no relayout across the lane dim).
        attn = attn + jnp.dot(oh.reshape(Bb * S, hd).astype(jnp.bfloat16),
                              w_out[lo:hi, :],
                              preferred_element_type=jnp.float32)

    # ---- residual + LayerNorm 1 ----
    src = x + attn + b_out
    mu = jnp.mean(src, axis=-1, keepdims=True)
    var = jnp.mean((src - mu) ** 2, axis=-1, keepdims=True)
    src = (src - mu) * lax.rsqrt(var + eps) * g1 + be1

    # ---- feed-forward + residual + LayerNorm 2 ----
    h1 = jnp.dot(src.astype(jnp.bfloat16), w1_ref[0],
                 preferred_element_type=jnp.float32) + b1
    h1 = jnp.maximum(h1, 0.0)                                  # ReLU
    src2 = jnp.dot(h1.astype(jnp.bfloat16), w2_ref[0],
                   preferred_element_type=jnp.float32) + b2
    src = src + src2
    mu = jnp.mean(src, axis=-1, keepdims=True)
    var = jnp.mean((src - mu) ** 2, axis=-1, keepdims=True)
    src = (src - mu) * lax.rsqrt(var + eps) * g2 + be2

    out_ref[...] = src.reshape(Bb, S, D)               # carry / final output


# ----------------------------------------------------------------------------
# Host-side parameter packing: pre-transpose, fold the 1/sqrt(hd) scale into
# W_q/b_q, stack layers on a leading axis, pack all small vectors into one slab.
# ----------------------------------------------------------------------------
def pack_block_params(blocks, nhead):
    D = blocks[0]["w_out"].shape[0]
    ff = blocks[0]["w1"].shape[0]
    hd = D // nhead
    scale = 1.0 / np.sqrt(float(hd))
    pmax = max(3 * D, ff)
    pmax = ((pmax + 127) // 128) * 128                 # lane-align packed slab

    def row(vvv):
        return jnp.pad(vvv.astype(jnp.float32), (0, pmax - vvv.shape[0]))[None, :]

    w_in_s, w_out_s, w1_s, w2_s, vec_s = [], [], [], [], []
    for blk in blocks:
        wq, wk, wv = blk["w_in"][:D], blk["w_in"][D:2 * D], blk["w_in"][2 * D:]
        w_in_t = jnp.concatenate([wq.T * scale, wk.T, wv.T], axis=1)  # (D, 3D)
        b_in = jnp.concatenate([blk["b_in"][:D] * scale, blk["b_in"][D:]])
        w_in_s.append(w_in_t.astype(jnp.bfloat16))
        w_out_s.append(blk["w_out"].T.astype(jnp.bfloat16))           # (D, D)
        w1_s.append(blk["w1"].T.astype(jnp.bfloat16))                 # (D, ff)
        w2_s.append(blk["w2"].T.astype(jnp.bfloat16))                 # (ff, D)
        vec_s.append(jnp.concatenate(
            [row(b_in), row(blk["b_out"]), row(blk["g1"]), row(blk["be1"]),
             row(blk["b1"]), row(blk["b2"]), row(blk["g2"]), row(blk["be2"])],
            axis=0))                                                  # (8, pmax)
    return dict(w_in=jnp.stack(w_in_s), w_out=jnp.stack(w_out_s),
                w1=jnp.stack(w1_s), w2=jnp.stack(w2_s), vec=jnp.stack(vec_s))


def transformer_stack(h_bsd, packed, *, nhead, valid_len=None, batch_block=None):
    """Apply ALL transformer layers in one fused pallas_call.  h_bsd: (B,S,D) f32."""
    B, S, D = h_bsd.shape
    L = packed["w_in"].shape[0]
    ff = packed["w1"].shape[-1]
    pmax = packed["vec"].shape[-1]
    valid_len = S if valid_len is None else valid_len

    bb = batch_block or min(B, 8)
    nb = pl.cdiv(B, bb)
    Bp = nb * bb
    if Bp != B:
        h_bsd = jnp.concatenate(
            [h_bsd, jnp.zeros((Bp - B, S, D), h_bsd.dtype)], axis=0)

    kernel = functools.partial(_stack_kernel, nhead=nhead, valid_len=valid_len)
    out = pl.pallas_call(
        kernel,
        out_shape=jax.ShapeDtypeStruct((Bp, S, D), jnp.float32),
        grid=(nb, L),
        in_specs=[
            # activations: index depends only on b -> fetched once per batch block
            pl.BlockSpec((bb, S, D), lambda b, l: (b, 0, 0)),
            pl.BlockSpec((1, D, 3 * D), lambda b, l: (l, 0, 0)),   # W_in^T (Q pre-scaled)
            pl.BlockSpec((1, D, D), lambda b, l: (l, 0, 0)),       # W_out^T
            pl.BlockSpec((1, D, ff), lambda b, l: (l, 0, 0)),      # W1^T
            pl.BlockSpec((1, ff, D), lambda b, l: (l, 0, 0)),      # W2^T
            pl.BlockSpec((1, 8, pmax), lambda b, l: (l, 0, 0)),    # packed vectors
        ],
        out_specs=pl.BlockSpec((bb, S, D), lambda b, l: (b, 0, 0)),
        compiler_params=pltpu.CompilerParams(
            dimension_semantics=("parallel", "arbitrary")),
    )(h_bsd, packed["w_in"], packed["w_out"], packed["w1"],
      packed["w2"], packed["vec"])
    return out[:B]


# ----------------------------------------------------------------------------
# Glue: TopologicalEncoding (host numpy eig), embedding, padding, truncation.
# ----------------------------------------------------------------------------
def topological_encode(adj_np, encoding_size):
    # TODO(synk): np.linalg.eig has no Pallas equivalent; kept as host preprocessing.
    n = adj_np.shape[0]
    in_deg = adj_np.sum(axis=0)
    L = np.diag(in_deg) - adj_np
    _, V = np.linalg.eig(L)
    momenta = np.dot(L, V)
    clipping = encoding_size - n
    if clipping > 0:
        momenta = np.pad(momenta, ((0, 0), (0, clipping)))
    elif clipping < 0:
        momenta = momenta[:, :encoding_size]
    return np.real(momenta).astype(np.float32)


def graphormer_forward(atomic_list, adj_list, params, *, d_model, nhead,
                       encoding_size, concatenate_encoding=True):
    """Reproduces Graphormer.forward(graphs) for a batch of graphs."""
    per_graph_h = []
    for atomic, adj in zip(atomic_list, adj_list):
        enc = jnp.asarray(topological_encode(adj, encoding_size))          # (n, enc)
        emb = jnp.take(params["embed"], jnp.asarray(atomic, jnp.int32), axis=0)
        if concatenate_encoding:
            h = jnp.concatenate([enc, emb], axis=-1)                       # (n, D)
        else:
            h = enc + emb
        per_graph_h.append(h)

    num_nodes = [h.shape[0] for h in per_graph_h]
    B = len(per_graph_h)
    S = max(num_nodes)                      # == PyTorch pad_sequence length
    S_pad = max(8, ((S + 7) // 8) * 8)      # sublane alignment; masked in-kernel
    h_pad = jnp.zeros((B, S_pad, d_model), jnp.float32)
    for i, h in enumerate(per_graph_h):
        h_pad = h_pad.at[i, :h.shape[0], :].set(h)

    packed = pack_block_params(params["blocks"], nhead)
    h_out = transformer_stack(h_pad, packed, nhead=nhead, valid_len=S)

    truncated = [h_out[i, :n, :] for i, n in enumerate(num_nodes)]
    return jnp.concatenate(truncated, axis=0)                              # (sum_n, D)


# ----------------------------------------------------------------------------
# Pure-JAX f32 reference of one block (sanity check vs PyTorch semantics).
# ----------------------------------------------------------------------------
def _layernorm(x, g, b, eps=1e-5):
    mu = jnp.mean(x, axis=-1, keepdims=True)
    var = jnp.mean((x - mu) ** 2, axis=-1, keepdims=True)
    return (x - mu) / jnp.sqrt(var + eps) * g + b


def ref_block(h, blk, nhead):
    B, S, D = h.shape
    hd = D // nhead
    qkv = h @ blk["w_in"].T + blk["b_in"]
    q, k, v = qkv[..., :D], qkv[..., D:2 * D], qkv[..., 2 * D:]
    q = q.reshape(B, S, nhead, hd).transpose(0, 2, 1, 3) / jnp.sqrt(jnp.float32(hd))
    k = k.reshape(B, S, nhead, hd).transpose(0, 2, 1, 3)
    v = v.reshape(B, S, nhead, hd).transpose(0, 2, 1, 3)
    p = jax.nn.softmax(jnp.einsum("bhqd,bhkd->bhqk", q, k), axis=-1)
    o = jnp.einsum("bhqk,bhkd->bhqd", p, v).transpose(0, 2, 1, 3).reshape(B, S, D)
    src = _layernorm(h + o @ blk["w_out"].T + blk["b_out"], blk["g1"], blk["be1"])
    ffn = jax.nn.relu(src @ blk["w1"].T + blk["b1"]) @ blk["w2"].T + blk["b2"]
    return _layernorm(src + ffn, blk["g2"], blk["be2"])


# ----------------------------------------------------------------------------
# Parameter init (deterministic, synthetic).
# ----------------------------------------------------------------------------
def init_params(key, *, d_model, dim_ff, depth, alphabet_size, emb_dim):
    k_emb, key = jax.random.split(key)
    params = {"embed": 0.1 * jax.random.normal(k_emb, (alphabet_size, emb_dim),
                                               jnp.float32)}
    blocks = []
    for _ in range(depth):
        ks = jax.random.split(key, 5)
        key = ks[0]
        blocks.append(dict(
            w_in=0.05 * jax.random.normal(ks[1], (3 * d_model, d_model), jnp.float32),
            b_in=jnp.zeros((3 * d_model,), jnp.float32),
            w_out=0.05 * jax.random.normal(ks[2], (d_model, d_model), jnp.float32),
            b_out=jnp.zeros((d_model,), jnp.float32),
            g1=jnp.ones((d_model,), jnp.float32),
            be1=jnp.zeros((d_model,), jnp.float32),
            w1=0.05 * jax.random.normal(ks[3], (dim_ff, d_model), jnp.float32),
            b1=jnp.zeros((dim_ff,), jnp.float32),
            w2=0.05 * jax.random.normal(ks[4], (d_model, dim_ff), jnp.float32),
            b2=jnp.zeros((d_model,), jnp.float32),
            g2=jnp.ones((d_model,), jnp.float32),
            be2=jnp.zeros((d_model,), jnp.float32),
        ))
    params["blocks"] = blocks
    return params


if __name__ == "__main__":
    # Small configuration consistent with the module's __init__.
    d_model = 64
    depth = 2
    nhead = 4
    expansion_factor = 2
    alphabet_size = 100
    encoding_size = 16
    dim_ff = d_model * expansion_factor
    num_nodes = [6, 8]                       # two graphs in the batch

    key = jax.random.PRNGKey(0)
    key, k_data = jax.random.split(key)
    params = init_params(key, d_model=d_model, dim_ff=dim_ff, depth=depth,
                         alphabet_size=alphabet_size,
                         emb_dim=d_model - encoding_size)

    # Synthetic graphs: symmetric 0/1 adjacency (writable numpy) + node labels.
    atomic_list, adj_list = [], []
    for n in num_nodes:
        k_data, ka, kn = jax.random.split(k_data, 3)
        A = np.array(jax.random.uniform(ka, (n, n)) < 0.4, dtype=np.float32)
        A = np.maximum(A, A.T)               # new writable array
        np.fill_diagonal(A, 0.0)
        adj_list.append(A)
        atomic_list.append(np.asarray(
            jax.random.randint(kn, (n,), 0, alphabet_size), np.int32))

    out = graphormer_forward(atomic_list, adj_list, params,
                             d_model=d_model, nhead=nhead,
                             encoding_size=encoding_size,
                             concatenate_encoding=True)
    out = jax.block_until_ready(out)
    assert out.shape == (sum(num_nodes), d_model)
    assert bool(jnp.all(jnp.isfinite(out)))

    # Sanity check against a pure-JAX f32 reference of the transformer stack
    # (kernel uses bf16 matmul operands + approx reciprocal -> modest tolerance).
    per_graph_h = []
    for atomic, adj in zip(atomic_list, adj_list):
        enc = jnp.asarray(topological_encode(adj, encoding_size))
        emb = jnp.take(params["embed"], jnp.asarray(atomic, jnp.int32), axis=0)
        per_graph_h.append(jnp.concatenate([enc, emb], axis=-1))
    S = max(num_nodes)
    h_ref = jnp.zeros((len(num_nodes), S, d_model), jnp.float32)
    for i, h in enumerate(per_graph_h):
        h_ref = h_ref.at[i, :h.shape[0], :].set(h)
    for blk in params["blocks"]:
        h_ref = ref_block(h_ref, blk, nhead)
    ref_out = jnp.concatenate([h_ref[i, :n, :] for i, n in enumerate(num_nodes)], 0)
    max_err = float(jnp.max(jnp.abs(out - ref_out)))
    assert max_err < 8e-2, f"mismatch vs reference: {max_err}"

    print("KERNEL_OK")
</pallas_src>

<mosaic_0001>
module attributes {stable_mosaic.version = 11 : i64} {
  func.func @_stack_kernel(%arg0: i32, %arg1: i32, %arg2: memref<2x8x64xf32, #tpu.memory_space<vmem>>, %arg3: memref<1x64x192xbf16, #tpu.memory_space<vmem>>, %arg4: memref<1x64x64xbf16, #tpu.memory_space<vmem>>, %arg5: memref<1x64x128xbf16, #tpu.memory_space<vmem>>, %arg6: memref<1x128x64xbf16, #tpu.memory_space<vmem>>, %arg7: memref<1x8x256xf32, #tpu.memory_space<vmem>>, %arg8: memref<2x8x64xf32, #tpu.memory_space<vmem>>) attributes {dimension_semantics = [#tpu.dimension_semantics<parallel>, #tpu.dimension_semantics<arbitrary>], iteration_bounds = array<i64: 1, 2>, scalar_prefetch = 0 : i64, scratch_operands = 0 : i64, tpu.core_type = #tpu.core_type<tc>, window_params = [{transform_indices = @transform_0, window_bounds = array<i64: 2, 8, 64>}, {transform_indices = @transform_1, window_bounds = array<i64: 1, 64, 192>}, {transform_indices = @transform_2, window_bounds = array<i64: 1, 64, 64>}, {transform_indices = @transform_3, window_bounds = array<i64: 1, 64, 128>}, {transform_indices = @transform_4, window_bounds = array<i64: 1, 128, 64>}, {transform_indices = @transform_5, window_bounds = array<i64: 1, 8, 256>}, {transform_indices = @transform_6, window_bounds = array<i64: 2, 8, 64>}]} {
    %c0_i32 = arith.constant 0 : i32
    %0 = arith.cmpi eq, %arg1, %c0_i32 : i32
    %1 = arith.extui %0 : i1 to i32
    %c0_i32_0 = arith.constant 0 : i32
    %2 = arith.cmpi ne, %1, %c0_i32_0 : i32
    scf.if %2 {
      %c0_55 = arith.constant 0 : index
      %c0_56 = arith.constant 0 : index
      %c0_57 = arith.constant 0 : index
      %181 = vector.load %arg2[%c0_55, %c0_56, %c0_57] : memref<2x8x64xf32, #tpu.memory_space<vmem>>, vector<2x8x64xf32>
      %c0_58 = arith.constant 0 : index
      %c0_59 = arith.constant 0 : index
      %c0_60 = arith.constant 0 : index
      %182 = vector.load %arg8[%c0_58, %c0_59, %c0_60] : memref<2x8x64xf32, #tpu.memory_space<vmem>>, vector<2x8x64xf32>
      tpu.vector_store %arg8[%c0_58, %c0_59, %c0_60], %181 {strides = array<i32>} : memref<2x8x64xf32, #tpu.memory_space<vmem>>, vector<2x8x64xf32>,
    } else {
    }
    %c0 = arith.constant 0 : index
    %c0_1 = arith.constant 0 : index
    %c0_2 = arith.constant 0 : index
    %3 = vector.load %arg8[%c0, %c0_1, %c0_2] : memref<2x8x64xf32, #tpu.memory_space<vmem>>, vector<2x8x64xf32>
    %4 = vector.shape_cast %3 : vector<2x8x64xf32> to vector<16x64xf32>
    %c0_3 = arith.constant 0 : index
    %c0_4 = arith.constant 0 : index
    %c0_5 = arith.constant 0 : index
    %5 = vector.load %arg7[%c0_3, %c0_4, %c0_5] : memref<1x8x256xf32, #tpu.memory_space<vmem>>, vector<1x8x256xf32>
    %6 = vector.shape_cast %5 : vector<1x8x256xf32> to vector<8x256xf32>
    %7 = vector.extract_strided_slice %6 {offsets = [0, 0], sizes = [1, 192], strides = [1, 1]} : vector<8x256xf32> to vector<1x192xf32>
    %8 = vector.extract_strided_slice %6 {offsets = [1, 0], sizes = [1, 64], strides = [1, 1]} : vector<8x256xf32> to vector<1x64xf32>
    %9 = vector.extract_strided_slice %6 {offsets = [2, 0], sizes = [1, 64], strides = [1, 1]} : vector<8x256xf32> to vector<1x64xf32>
    %10 = vector.extract_strided_slice %6 {offsets = [3, 0], sizes = [1, 64], strides = [1, 1]} : vector<8x256xf32> to vector<1x64xf32>
    %11 = vector.extract_strided_slice %6 {offsets = [4, 0], sizes = [1, 128], strides = [1, 1]} : vector<8x256xf32> to vector<1x128xf32>
    %12 = vector.extract_strided_slice %6 {offsets = [5, 0], sizes = [1, 64], strides = [1, 1]} : vector<8x256xf32> to vector<1x64xf32>
    %13 = vector.extract_strided_slice %6 {offsets = [6, 0], sizes = [1, 64], strides = [1, 1]} : vector<8x256xf32> to vector<1x64xf32>
    %14 = vector.extract_strided_slice %6 {offsets = [7, 0], sizes = [1, 64], strides = [1, 1]} : vector<8x256xf32> to vector<1x64xf32>
    %15 = arith.truncf %4 : vector<16x64xf32> to vector<16x64xbf16>
    %c0_6 = arith.constant 0 : index
    %c0_7 = arith.constant 0 : index
    %c0_8 = arith.constant 0 : index
    %16 = vector.load %arg3[%c0_6, %c0_7, %c0_8] : memref<1x64x192xbf16, #tpu.memory_space<vmem>>, vector<1x64x192xbf16>
    %17 = vector.shape_cast %16 : vector<1x64x192xbf16> to vector<64x192xbf16>
    %cst = arith.constant dense<0.000000e+00> : vector<16x192xf32>
    %18 = tpu.matmul %15, %17, %cst {dimension_numbers = #tpu.dot_dimension_numbers<[1], [0], [0], [1], [0, 0, 1, 1], [], []>} : vector<16x64xbf16>, vector<64x192xbf16>, vector<16x192xf32> -> vector<16x192xf32>
    %19 = vector.broadcast %7 : vector<1x192xf32> to vector<16x192xf32>
    %20 = arith.addf %18, %19 : vector<16x192xf32>
    %21 = vector.extract_strided_slice %20 {offsets = [0, 0], sizes = [16, 64], strides = [1, 1]} : vector<16x192xf32> to vector<16x64xf32>
    %22 = vector.shape_cast %21 : vector<16x64xf32> to vector<2x8x64xf32>
    %23 = arith.truncf %22 : vector<2x8x64xf32> to vector<2x8x64xbf16>
    %24 = vector.extract_strided_slice %20 {offsets = [0, 64], sizes = [16, 64], strides = [1, 1]} : vector<16x192xf32> to vector<16x64xf32>
    %25 = vector.shape_cast %24 : vector<16x64xf32> to vector<2x8x64xf32>
    %26 = arith.truncf %25 : vector<2x8x64xf32> to vector<2x8x64xbf16>
    %27 = vector.extract_strided_slice %20 {offsets = [0, 128], sizes = [16, 64], strides = [1, 1]} : vector<16x192xf32> to vector<16x64xf32>
    %28 = vector.shape_cast %27 : vector<16x64xf32> to vector<2x8x64xf32>
    %29 = arith.truncf %28 : vector<2x8x64xf32> to vector<2x8x64xbf16>
    %c0_9 = arith.constant 0 : index
    %c0_10 = arith.constant 0 : index
    %c0_11 = arith.constant 0 : index
    %30 = vector.load %arg4[%c0_9, %c0_10, %c0_11] : memref<1x64x64xbf16, #tpu.memory_space<vmem>>, vector<1x64x64xbf16>
    %31 = vector.shape_cast %30 : vector<1x64x64xbf16> to vector<64x64xbf16>
    %cst_12 = arith.constant 0.000000e+00 : f32
    %32 = vector.broadcast %cst_12 : f32 to vector<16x64xf32>
    %33 = vector.extract_strided_slice %23 {offsets = [0, 0, 0], sizes = [2, 8, 16], strides = [1, 1, 1]} : vector<2x8x64xbf16> to vector<2x8x16xbf16>
    %34 = vector.extract_strided_slice %26 {offsets = [0, 0, 0], sizes = [2, 8, 16], strides = [1, 1, 1]} : vector<2x8x64xbf16> to vector<2x8x16xbf16>
    %35 = vector.extract_strided_slice %29 {offsets = [0, 0, 0], sizes = [2, 8, 16], strides = [1, 1, 1]} : vector<2x8x64xbf16> to vector<2x8x16xbf16>
    "tpu.trace_start"() <{level = 10 : i32, message = "bqd,bkd->bqk"}> : () -> ()
    %cst_13 = arith.constant dense<0.000000e+00> : vector<2x8x8xf32>
    %36 = tpu.matmul %33, %34, %cst_13 {dimension_numbers = #tpu.dot_dimension_numbers<[2], [2], [1], [1], [0, 0, 0, 1, 1, 1], [0], [0]>} : vector<2x8x16xbf16>, vector<2x8x16xbf16>, vector<2x8x8xf32> -> vector<2x8x8xf32>
    "tpu.trace_stop"() : () -> ()
    %cst_14 = arith.constant dense<0xFF800000> : vector<2x8xf32>
    %37 = vector.multi_reduction <maximumf>, %36, %cst_14 [2] : vector<2x8x8xf32> to vector<2x8xf32>
    %38 = vector.shape_cast %37 : vector<2x8xf32> to vector<2x8x1xf32>
    %39 = vector.broadcast %38 : vector<2x8x1xf32> to vector<2x8x8xf32>
    %40 = arith.subf %36, %39 : vector<2x8x8xf32>
    %41 = math.exp %40 : vector<2x8x8xf32>
    %cst_15 = arith.constant dense<0.000000e+00> : vector<2x8xf32>
    %42 = vector.multi_reduction <add>, %41, %cst_15 [2] : vector<2x8x8xf32> to vector<2x8xf32>
    %43 = vector.shape_cast %42 : vector<2x8xf32> to vector<2x8x1xf32>
    %44 = tpu.reciprocal %43 {approx = true} : vector<2x8x1xf32> -> vector<2x8x1xf32>
    %45 = vector.broadcast %44 : vector<2x8x1xf32> to vector<2x8x8xf32>
    %46 = arith.mulf %41, %45 : vector<2x8x8xf32>
    %47 = arith.truncf %46 : vector<2x8x8xf32> to vector<2x8x8xbf16>
    "tpu.trace_start"() <{level = 10 : i32, message = "bqk,bkd->bqd"}> : () -> ()
    %cst_16 = arith.constant dense<0.000000e+00> : vector<2x8x16xf32>
    %48 = tpu.matmul %47, %35, %cst_16 {dimension_numbers = #tpu.dot_dimension_numbers<[2], [1], [1], [2], [0, 0, 0, 1, 1, 2], [0], [0]>} : vector<2x8x8xbf16>, vector<2x8x16xbf16>, vector<2x8x16xf32> -> vector<2x8x16xf32>
    "tpu.trace_stop"() : () -> ()
    %49 = vector.shape_cast %48 : vector<2x8x16xf32> to vector<16x16xf32>
    %50 = arith.truncf %49 : vector<16x16xf32> to vector<16x16xbf16>
    %51 = vector.extract_strided_slice %31 {offsets = [0, 0], sizes = [16, 64], strides = [1, 1]} : vector<64x64xbf16> to vector<16x64xbf16>
    %cst_17 = arith.constant dense<0.000000e+00> : vector<16x64xf32>
    %52 = tpu.matmul %50, %51, %cst_17 {dimension_numbers = #tpu.dot_dimension_numbers<[1], [0], [0], [1], [0, 0, 1, 1], [], []>} : vector<16x16xbf16>, vector<16x64xbf16>, vector<16x64xf32> -> vector<16x64xf32>
    %53 = arith.addf %32, %52 : vector<16x64xf32>
    %54 = vector.extract_strided_slice %23 {offsets = [0, 0, 16], sizes = [2, 8, 16], strides = [1, 1, 1]} : vector<2x8x64xbf16> to vector<2x8x16xbf16>
    %55 = vector.extract_strided_slice %26 {offsets = [0, 0, 16], sizes = [2, 8, 16], strides = [1, 1, 1]} : vector<2x8x64xbf16> to vector<2x8x16xbf16>
    %56 = vector.extract_strided_slice %29 {offsets = [0, 0, 16], sizes = [2, 8, 16], strides = [1, 1, 1]} : vector<2x8x64xbf16> to vector<2x8x16xbf16>
    "tpu.trace_start"() <{level = 10 : i32, message = "bqd,bkd->bqk"}> : () -> ()
    %cst_18 = arith.constant dense<0.000000e+00> : vector<2x8x8xf32>
    %57 = tpu.matmul %54, %55, %cst_18 {dimension_numbers = #tpu.dot_dimension_numbers<[2], [2], [1], [1], [0, 0, 0, 1, 1, 1], [0], [0]>} : vector<2x8x16xbf16>, vector<2x8x16xbf16>, vector<2x8x8xf32> -> vector<2x8x8xf32>
    "tpu.trace_stop"() : () -> ()
    %cst_19 = arith.constant dense<0xFF800000> : vector<2x8xf32>
    %58 = vector.multi_reduction <maximumf>, %57, %cst_19 [2] : vector<2x8x8xf32> to vector<2x8xf32>
    %59 = vector.shape_cast %58 : vector<2x8xf32> to vector<2x8x1xf32>
    %60 = vector.broadcast %59 : vector<2x8x1xf32> to vector<2x8x8xf32>
    %61 = arith.subf %57, %60 : vector<2x8x8xf32>
    %62 = math.exp %61 : vector<2x8x8xf32>
    %cst_20 = arith.constant dense<0.000000e+00> : vector<2x8xf32>
    %63 = vector.multi_reduction <add>, %62, %cst_20 [2] : vector<2x8x8xf32> to vector<2x8xf32>
    %64 = vector.shape_cast %63 : vector<2x8xf32> to vector<2x8x1xf32>
    %65 = tpu.reciprocal %64 {approx = true} : vector<2x8x1xf32> -> vector<2x8x1xf32>
    %66 = vector.broadcast %65 : vector<2x8x1xf32> to vector<2x8x8xf32>
    %67 = arith.mulf %62, %66 : vector<2x8x8xf32>
    %68 = arith.truncf %67 : vector<2x8x8xf32> to vector<2x8x8xbf16>
    "tpu.trace_start"() <{level = 10 : i32, message = "bqk,bkd->bqd"}> : () -> ()
    %cst_21 = arith.constant dense<0.000000e+00> : vector<2x8x16xf32>
    %69 = tpu.matmul %68, %56, %cst_21 {dimension_numbers = #tpu.dot_dimension_numbers<[2], [1], [1], [2], [0, 0, 0, 1, 1, 2], [0], [0]>} : vector<2x8x8xbf16>, vector<2x8x16xbf16>, vector<2x8x16xf32> -> vector<2x8x16xf32>
    "tpu.trace_stop"() : () -> ()
    %70 = vector.shape_cast %69 : vector<2x8x16xf32> to vector<16x16xf32>
    %71 = arith.truncf %70 : vector<16x16xf32> to vector<16x16xbf16>
    %72 = vector.extract_strided_slice %31 {offsets = [16, 0], sizes = [16, 64], strides = [1, 1]} : vector<64x64xbf16> to vector<16x64xbf16>
    %cst_22 = arith.constant dense<0.000000e+00> : vector<16x64xf32>
    %73 = tpu.matmul %71, %72, %cst_22 {dimension_numbers = #tpu.dot_dimension_numbers<[1], [0], [0], [1], [0, 0, 1, 1], [], []>} : vector<16x16xbf16>, vector<16x64xbf16>, vector<16x64xf32> -> vector<16x64xf32>
    %74 = arith.addf %53, %73 : vector<16x64xf32>
    %75 = vector.extract_strided_slice %23 {offsets = [0, 0, 32], sizes = [2, 8, 16], strides = [1, 1, 1]} : vector<2x8x64xbf16> to vector<2x8x16xbf16>
    %76 = vector.extract_strided_slice %26 {offsets = [0, 0, 32], sizes = [2, 8, 16], strides = [1, 1, 1]} : vector<2x8x64xbf16> to vector<2x8x16xbf16>
    %77 = vector.extract_strided_slice %29 {offsets = [0, 0, 32], sizes = [2, 8, 16], strides = [1, 1, 1]} : vector<2x8x64xbf16> to vector<2x8x16xbf16>
    "tpu.trace_start"() <{level = 10 : i32, message = "bqd,bkd->bqk"}> : () -> ()
    %cst_23 = arith.constant dense<0.000000e+00> : vector<2x8x8xf32>
    %78 = tpu.matmul %75, %76, %cst_23 {dimension_numbers = #tpu.dot_dimension_numbers<[2], [2], [1], [1], [0, 0, 0, 1, 1, 1], [0], [0]>} : vector<2x8x16xbf16>, vector<2x8x16xbf16>, vector<2x8x8xf32> -> vector<2x8x8xf32>
    "tpu.trace_stop"() : () -> ()
    %cst_24 = arith.constant dense<0xFF800000> : vector<2x8xf32>
    %79 = vector.multi_reduction <maximumf>, %78, %cst_24 [2] : vector<2x8x8xf32> to vector<2x8xf32>
    %80 = vector.shape_cast %79 : vector<2x8xf32> to vector<2x8x1xf32>
    %81 = vector.broadcast %80 : vector<2x8x1xf32> to vector<2x8x8xf32>
    %82 = arith.subf %78, %81 : vector<2x8x8xf32>
    %83 = math.exp %82 : vector<2x8x8xf32>
    %cst_25 = arith.constant dense<0.000000e+00> : vector<2x8xf32>
    %84 = vector.multi_reduction <add>, %83, %cst_25 [2] : vector<2x8x8xf32> to vector<2x8xf32>
    %85 = vector.shape_cast %84 : vector<2x8xf32> to vector<2x8x1xf32>
    %86 = tpu.reciprocal %85 {approx = true} : vector<2x8x1xf32> -> vector<2x8x1xf32>
    %87 = vector.broadcast %86 : vector<2x8x1xf32> to vector<2x8x8xf32>
    %88 = arith.mulf %83, %87 : vector<2x8x8xf32>
    %89 = arith.truncf %88 : vector<2x8x8xf32> to vector<2x8x8xbf16>
    "tpu.trace_start"() <{level = 10 : i32, message = "bqk,bkd->bqd"}> : () -> ()
    %cst_26 = arith.constant dense<0.000000e+00> : vector<2x8x16xf32>
    %90 = tpu.matmul %89, %77, %cst_26 {dimension_numbers = #tpu.dot_dimension_numbers<[2], [1], [1], [2], [0, 0, 0, 1, 1, 2], [0], [0]>} : vector<2x8x8xbf16>, vector<2x8x16xbf16>, vector<2x8x16xf32> -> vector<2x8x16xf32>
    "tpu.trace_stop"() : () -> ()
    %91 = vector.shape_cast %90 : vector<2x8x16xf32> to vector<16x16xf32>
    %92 = arith.truncf %91 : vector<16x16xf32> to vector<16x16xbf16>
    %93 = vector.extract_strided_slice %31 {offsets = [32, 0], sizes = [16, 64], strides = [1, 1]} : vector<64x64xbf16> to vector<16x64xbf16>
    %cst_27 = arith.constant dense<0.000000e+00> : vector<16x64xf32>
    %94 = tpu.matmul %92, %93, %cst_27 {dimension_numbers = #tpu.dot_dimension_numbers<[1], [0], [0], [1], [0, 0, 1, 1], [], []>} : vector<16x16xbf16>, vector<16x64xbf16>, vector<16x64xf32> -> vector<16x64xf32>
    %95 = arith.addf %74, %94 : vector<16x64xf32>
    %96 = vector.extract_strided_slice %23 {offsets = [0, 0, 48], sizes = [2, 8, 16], strides = [1, 1, 1]} : vector<2x8x64xbf16> to vector<2x8x16xbf16>
    %97 = vector.extract_strided_slice %26 {offsets = [0, 0, 48], sizes = [2, 8, 16], strides = [1, 1, 1]} : vector<2x8x64xbf16> to vector<2x8x16xbf16>
    %98 = vector.extract_strided_slice %29 {offsets = [0, 0, 48], sizes = [2, 8, 16], strides = [1, 1, 1]} : vector<2x8x64xbf16> to vector<2x8x16xbf16>
    "tpu.trace_start"() <{level = 10 : i32, message = "bqd,bkd->bqk"}> : () -> ()
    %cst_28 = arith.constant dense<0.000000e+00> : vector<2x8x8xf32>
    %99 = tpu.matmul %96, %97, %cst_28 {dimension_numbers = #tpu.dot_dimension_numbers<[2], [2], [1], [1], [0, 0, 0, 1, 1, 1], [0], [0]>} : vector<2x8x16xbf16>, vector<2x8x16xbf16>, vector<2x8x8xf32> -> vector<2x8x8xf32>
    "tpu.trace_stop"() : () -> ()
    %cst_29 = arith.constant dense<0xFF800000> : vector<2x8xf32>
    %100 = vector.multi_reduction <maximumf>, %99, %cst_29 [2] : vector<2x8x8xf32> to vector<2x8xf32>
    %101 = vector.shape_cast %100 : vector<2x8xf32> to vector<2x8x1xf32>
    %102 = vector.broadcast %101 : vector<2x8x1xf32> to vector<2x8x8xf32>
    %103 = arith.subf %99, %102 : vector<2x8x8xf32>
    %104 = math.exp %103 : vector<2x8x8xf32>
    %cst_30 = arith.constant dense<0.000000e+00> : vector<2x8xf32>
    %105 = vector.multi_reduction <add>, %104, %cst_30 [2] : vector<2x8x8xf32> to vector<2x8xf32>
    %106 = vector.shape_cast %105 : vector<2x8xf32> to vector<2x8x1xf32>
    %107 = tpu.reciprocal %106 {approx = true} : vector<2x8x1xf32> -> vector<2x8x1xf32>
    %108 = vector.broadcast %107 : vector<2x8x1xf32> to vector<2x8x8xf32>
    %109 = arith.mulf %104, %108 : vector<2x8x8xf32>
    %110 = arith.truncf %109 : vector<2x8x8xf32> to vector<2x8x8xbf16>
    "tpu.trace_start"() <{level = 10 : i32, message = "bqk,bkd->bqd"}> : () -> ()
    %cst_31 = arith.constant dense<0.000000e+00> : vector<2x8x16xf32>
    %111 = tpu.matmul %110, %98, %cst_31 {dimension_numbers = #tpu.dot_dimension_numbers<[2], [1], [1], [2], [0, 0, 0, 1, 1, 2], [0], [0]>} : vector<2x8x8xbf16>, vector<2x8x16xbf16>, vector<2x8x16xf32> -> vector<2x8x16xf32>
    "tpu.trace_stop"() : () -> ()
    %112 = vector.shape_cast %111 : vector<2x8x16xf32> to vector<16x16xf32>
    %113 = arith.truncf %112 : vector<16x16xf32> to vector<16x16xbf16>
    %114 = vector.extract_strided_slice %31 {offsets = [48, 0], sizes = [16, 64], strides = [1, 1]} : vector<64x64xbf16> to vector<16x64xbf16>
    %cst_32 = arith.constant dense<0.000000e+00> : vector<16x64xf32>
    %115 = tpu.matmul %113, %114, %cst_32 {dimension_numbers = #tpu.dot_dimension_numbers<[1], [0], [0], [1], [0, 0, 1, 1], [], []>} : vector<16x16xbf16>, vector<16x64xbf16>, vector<16x64xf32> -> vector<16x64xf32>
    %116 = arith.addf %95, %115 : vector<16x64xf32>
    %117 = arith.addf %4, %116 : vector<16x64xf32>
    %118 = vector.broadcast %8 : vector<1x64xf32> to vector<16x64xf32>
    %119 = arith.addf %117, %118 : vector<16x64xf32>
    %cst_33 = arith.constant dense<0.000000e+00> : vector<16xf32>
    %120 = vector.multi_reduction <add>, %119, %cst_33 [1] : vector<16x64xf32> to vector<16xf32>
    %121 = vector.shape_cast %120 : vector<16xf32> to vector<16x1xf32>
    %cst_34 = arith.constant 6.400000e+01 : f32
    %122 = vector.broadcast %cst_34 : f32 to vector<16x1xf32>
    %123 = arith.divf %121, %122 : vector<16x1xf32>
    %124 = vector.broadcast %123 : vector<16x1xf32> to vector<16x64xf32>
    %125 = arith.subf %119, %124 : vector<16x64xf32>
    %126 = arith.mulf %125, %125 : vector<16x64xf32>
    %cst_35 = arith.constant dense<0.000000e+00> : vector<16xf32>
    %127 = vector.multi_reduction <add>, %126, %cst_35 [1] : vector<16x64xf32> to vector<16xf32>
    %128 = vector.shape_cast %127 : vector<16xf32> to vector<16x1xf32>
    %cst_36 = arith.constant 6.400000e+01 : f32
    %129 = vector.broadcast %cst_36 : f32 to vector<16x1xf32>
    %130 = arith.divf %128, %129 : vector<16x1xf32>
    %131 = vector.broadcast %123 : vector<16x1xf32> to vector<16x64xf32>
    %132 = arith.subf %119, %131 : vector<16x64xf32>
    %cst_37 = arith.constant 9.99999974E-6 : f32
    %133 = vector.broadcast %cst_37 : f32 to vector<16x1xf32>
    %134 = arith.addf %130, %133 : vector<16x1xf32>
    %135 = math.rsqrt %134 : vector<16x1xf32>
    %136 = vector.broadcast %135 : vector<16x1xf32> to vector<16x64xf32>
    %137 = arith.mulf %132, %136 : vector<16x64xf32>
    %138 = vector.broadcast %9 : vector<1x64xf32> to vector<16x64xf32>
    %139 = arith.mulf %137, %138 : vector<16x64xf32>
    %140 = vector.broadcast %10 : vector<1x64xf32> to vector<16x64xf32>
    %141 = arith.addf %139, %140 : vector<16x64xf32>
    %142 = arith.truncf %141 : vector<16x64xf32> to vector<16x64xbf16>
    %c0_38 = arith.constant 0 : index
    %c0_39 = arith.constant 0 : index
    %c0_40 = arith.constant 0 : index
    %143 = vector.load %arg5[%c0_38, %c0_39, %c0_40] : memref<1x64x128xbf16, #tpu.memory_space<vmem>>, vector<1x64x128xbf16>
    %144 = vector.shape_cast %143 : vector<1x64x128xbf16> to vector<64x128xbf16>
    %cst_41 = arith.constant dense<0.000000e+00> : vector<16x128xf32>
    %145 = tpu.matmul %142, %144, %cst_41 {dimension_numbers = #tpu.dot_dimension_numbers<[1], [0], [0], [1], [0, 0, 1, 1], [], []>} : vector<16x64xbf16>, vector<64x128xbf16>, vector<16x128xf32> -> vector<16x128xf32>
    %146 = vector.broadcast %11 : vector<1x128xf32> to vector<16x128xf32>
    %147 = arith.addf %145, %146 : vector<16x128xf32>
    %cst_42 = arith.constant 0.000000e+00 : f32
    %148 = vector.broadcast %cst_42 : f32 to vector<16x128xf32>
    %149 = arith.maximumf %147, %148 : vector<16x128xf32>
    %150 = arith.truncf %149 : vector<16x128xf32> to vector<16x128xbf16>
    %c0_43 = arith.constant 0 : index
    %c0_44 = arith.constant 0 : index
    %c0_45 = arith.constant 0 : index
    %151 = vector.load %arg6[%c0_43, %c0_44, %c0_45] : memref<1x128x64xbf16, #tpu.memory_space<vmem>>, vector<1x128x64xbf16>
    %152 = vector.shape_cast %151 : vector<1x128x64xbf16> to vector<128x64xbf16>
    %cst_46 = arith.constant dense<0.000000e+00> : vector<16x64xf32>
    %153 = tpu.matmul %150, %152, %cst_46 {dimension_numbers = #tpu.dot_dimension_numbers<[1], [0], [0], [1], [0, 0, 1, 1], [], []>} : vector<16x128xbf16>, vector<128x64xbf16>, vector<16x64xf32> -> vector<16x64xf32>
    %154 = vector.broadcast %12 : vector<1x64xf32> to vector<16x64xf32>
    %155 = arith.addf %153, %154 : vector<16x64xf32>
    %156 = arith.addf %141, %155 : vector<16x64xf32>
    %cst_47 = arith.constant dense<0.000000e+00> : vector<16xf32>
    %157 = vector.multi_reduction <add>, %156, %cst_47 [1] : vector<16x64xf32> to vector<16xf32>
    %158 = vector.shape_cast %157 : vector<16xf32> to vector<16x1xf32>
    %cst_48 = arith.constant 6.400000e+01 : f32
    %159 = vector.broadcast %cst_48 : f32 to vector<16x1xf32>
    %160 = arith.divf %158, %159 : vector<16x1xf32>
    %161 = vector.broadcast %160 : vector<16x1xf32> to vector<16x64xf32>
    %162 = arith.subf %156, %161 : vector<16x64xf32>
    %163 = arith.mulf %162, %162 : vector<16x64xf32>
    %cst_49 = arith.constant dense<0.000000e+00> : vector<16xf32>
    %164 = vector.multi_reduction <add>, %163, %cst_49 [1] : vector<16x64xf32> to vector<16xf32>
    %165 = vector.shape_cast %164 : vector<16xf32> to vector<16x1xf32>
    %cst_50 = arith.constant 6.400000e+01 : f32
    %166 = vector.broadcast %cst_50 : f32 to vector<16x1xf32>
    %167 = arith.divf %165, %166 : vector<16x1xf32>
    %168 = vector.broadcast %160 : vector<16x1xf32> to vector<16x64xf32>
    %169 = arith.subf %156, %168 : vector<16x64xf32>
    %cst_51 = arith.constant 9.99999974E-6 : f32
    %170 = vector.broadcast %cst_51 : f32 to vector<16x1xf32>
    %171 = arith.addf %167, %170 : vector<16x1xf32>
    %172 = math.rsqrt %171 : vector<16x1xf32>
    %173 = vector.broadcast %172 : vector<16x1xf32> to vector<16x64xf32>
    %174 = arith.mulf %169, %173 : vector<16x64xf32>
    %175 = vector.broadcast %13 : vector<1x64xf32> to vector<16x64xf32>
    %176 = arith.mulf %174, %175 : vector<16x64xf32>
    %177 = vector.broadcast %14 : vector<1x64xf32> to vector<16x64xf32>
    %178 = arith.addf %176, %177 : vector<16x64xf32>
    %179 = vector.shape_cast %178 : vector<16x64xf32> to vector<2x8x64xf32>
    %c0_52 = arith.constant 0 : index
    %c0_53 = arith.constant 0 : index
    %c0_54 = arith.constant 0 : index
    %180 = vector.load %arg8[%c0_52, %c0_53, %c0_54] : memref<2x8x64xf32, #tpu.memory_space<vmem>>, vector<2x8x64xf32>
    tpu.vector_store %arg8[%c0_52, %c0_53, %c0_54], %179 {strides = array<i32>} : memref<2x8x64xf32, #tpu.memory_space<vmem>>, vector<2x8x64xf32>,
    return
  }
  func.func @transform_0(%arg0: i32, %arg1: i32) -> (i32, i32, i32) {
    %c0_i32 = arith.constant 0 : i32
    %c0_i32_0 = arith.constant 0 : i32
    %c0_i32_1 = arith.constant 0 : i32
    return %arg0, %c0_i32, %c0_i32_0 : i32, i32, i32
  }
  func.func @transform_1(%arg0: i32, %arg1: i32) -> (i32, i32, i32) {
    %c0_i32 = arith.constant 0 : i32
    %c0_i32_0 = arith.constant 0 : i32
    %c0_i32_1 = arith.constant 0 : i32
    return %arg1, %c0_i32, %c0_i32_0 : i32, i32, i32
  }
  func.func @transform_2(%arg0: i32, %arg1: i32) -> (i32, i32, i32) {
    %c0_i32 = arith.constant 0 : i32
    %c0_i32_0 = arith.constant 0 : i32
    %c0_i32_1 = arith.constant 0 : i32
    return %arg1, %c0_i32, %c0_i32_0 : i32, i32, i32
  }
  func.func @transform_3(%arg0: i32, %arg1: i32) -> (i32, i32, i32) {
    %c0_i32 = arith.constant 0 : i32
    %c0_i32_0 = arith.constant 0 : i32
    %c0_i32_1 = arith.constant 0 : i32
    return %arg1, %c0_i32, %c0_i32_0 : i32, i32, i32
  }
  func.func @transform_4(%arg0: i32, %arg1: i32) -> (i32, i32, i32) {
    %c0_i32 = arith.constant 0 : i32
    %c0_i32_0 = arith.constant 0 : i32
    %c0_i32_1 = arith.constant 0 : i32
    return %arg1, %c0_i32, %c0_i32_0 : i32, i32, i32
  }
  func.func @transform_5(%arg0: i32, %arg1: i32) -> (i32, i32, i32) {
    %c0_i32 = arith.constant 0 : i32
    %c0_i32_0 = arith.constant 0 : i32
    %c0_i32_1 = arith.constant 0 : i32
    return %arg1, %c0_i32, %c0_i32_0 : i32, i32, i32
  }
  func.func @transform_6(%arg0: i32, %arg1: i32) -> (i32, i32, i32) {
    %c0_i32 = arith.constant 0 : i32
    %c0_i32_0 = arith.constant 0 : i32
    %c0_i32_1 = arith.constant 0 : i32
    return %arg0, %c0_i32, %c0_i32_0 : i32, i32, i32
  }
}

</mosaic_0001>

<bundles_post_ra>
// kernel: tpu_custom_call.1
= control target key start
LH: loop header
LB: loop body
LE: loop exit
PB: predicated region body
PF: predicated region fallthrough
CT: control target
= control target key end

     0   :  { %s3200_s0 = inlined_call_operand.hbm [shape: f32[2,8,64], index: 0, kind: input, shape index: {}]   ;;  %s3201_s1 = inlined_call_operand.vmem [shape: bf16[2,64,192], index: 1, kind: input, shape index: {}]   ;;  %s3202_s2 = inlined_call_operand.vmem [shape: bf16[2,64,64], index: 2, kind: input, shape index: {}]   ;;  %s3203_s3 = inlined_call_operand.hbm [shape: bf16[2,64,128], index: 3, kind: input, shape index: {}]   ;;  %s3204_s4 = inlined_call_operand.vmem [shape: bf16[2,128,64], index: 4, kind: input, shape index: {}]   ;;  %s3205_s5 = inlined_call_operand.hbm [shape: f32[2,8,256], index: 5, kind: input, shape index: {}]   ;;  %s3206_s6 = inlined_call_operand.hbm [shape: f32[2,8,64], index: 6, kind: output, shape index: {}]  }
   0x1   :  { %3215 = sst [smem:[#allocation14_spill]] %s3203_s3 }
   0x2   :  { %11 = vsyncpa [#allocation3], 0 }
   0x3   :  { %12 = vsyncpa [#allocation6], 0 }
   0x4   :  { %14 = vsyncpa [#allocation6 + $0x1], 0 }
   0x5   :  { %15 = vsyncpa [#allocation4], 0  ;;  %s2710_s21 = smov 0   ;;  %s2712_s22 = smov 0  }
   0x6   :  { %s2714_s23 = smov 0   ;;  %s2716_s24 = smov 0  }
   0x7   :  { %s2718_s25 = smov 0   ;;  %s2720_s26 = smov 0  }
   0x8 LB: > { %3216 = sst [smem:[#allocation12_spill]] %s2649_s25  ;;  %s30_s27 = sadd.s32 1, %s2649_s25  ;;  %s2653_s26 = sphi %s2720_s26, %s21_s26   ;;  %s2649_s25 = sphi %s2718_s25, %s3231_s25   ;;  %s2645_s24 = sphi %s2716_s24, %s3230_s24   ;;  %s2641_s23 = sphi %s2714_s23, %s3234_s23   ;;  %s2637_s22 = sphi %s2712_s22, %s3233_s22   ;;  %s2633_s21 = sphi %s2710_s21, %s3232_s21  }
   0x9   : > { %s118_s28 = sadd.s32 1, %s2641_s23  ;;  %p31_p0 = scmp.ge.s32.totalorder %s30_s27, 2 }
   0xa   : > { %p125_p1 = scmp.ne.s32.totalorder %s2641_s23, %s2637_s22  ;;  %p126_p2 = scmp.eq.s32.totalorder %s2653_s26, 0 }
   0xb   : > { %s3236_s27 = smov (%p31_p0, %s30_s27), 0  ;;  %p2343_p4 = scmp.lt.s32.totalorder %s2653_s26, 2 }
   0xc   : > { %3217 = sst [smem:[#allocation13_spill]] %s3236_s27  ;;  %p127_p3 = por %p126_p2, %p125_p1 }
   0xd   : > { %s115_s29 = ssub.s32 %s2649_s25, %s3236_s27  ;;  %s265_s30 = sand.u32 1, %s2653_s26  }
   0xe   : > { %p116_p5 = scmp.eq.s32.totalorder %s115_s29, 0  ;;  %s267_s7 = sand.u32 1, %s2641_s23  }
   0xf   : > { %s2108_s8 = sshll.u32 %s2649_s25, 9  ;;  %s2041_s10 = sshll.u32 %s267_s7, 5 }
  0x10   : > { %s2754_s9 = scalar_select %p116_p5, %s2641_s23, %s118_s28  }
  0x11   : > { %s3218_s3 = sld [smem:[#allocation14_spill]]  ;;  %p2763_p6 = pnand %p2343_p4, %p127_p3 }
  0x12   : > { %s269_s15 = scalar_lea.vmem [#allocation5], %s2041_s10  ;;  %s2769_s17 = scalar_lea.sflag [#allocation6], %s265_s30 }
  0x13   : > { %s3219_s14 = scalar_select %p2763_p6, 1, 0 }
  0x14   : > { %s276_s16 = sshll.u32 %s269_s15, 4  ;;  %p3210_p8 = pneg %p2763_p6  ;;  %s2767_s16 = int_to_ptr.vmem [resolvable:$true] %s276_s16 }
  0x17   : > { %s2761_s13 = scalar_lea.hbm %s3218_s3, %s2108_s8  ;;  %s2486_s28 = scalar_lea.hbm %s3218_s3, 1024 }
  0x18   : > { %s2481_s18 = scalar_lea.hbm %s2761_s13, 512  ;;  %p2487_p11 = scmp.lt.u32.totalorder %s2761_s13, %s3218_s3 }
  0x19   : > { %p2482_p7 = scmp.ne.s32.totalorder %s2761_s13, %s2481_s18  ;;  %p2488_p12 = scmp.lt.u32.totalorder %s2486_s28, %s2481_s18 }
  0x1a   : > { %p2490_p0 = scmp.lt.u32.totalorder %s2481_s18, %s2761_s13 }
  0x1b   : > { %p2484_p9 = pnand %p3210_p8, %p2482_p7  ;;  %p2489_p13 = por %p2488_p12, %p2487_p11 }
  0x1d   : > { %p2485_p10 = pneg %p2484_p9  ;;  %p2491_p1 = por %p2490_p0, %p2489_p13 }
  0x1f   : > { %p2492_p2 = pnand %p2491_p1, %p2485_p10 }
  0x21   : > { %2495 = shalt.err (!%p2492_p2)
}
  0x22   : > { %s2496_s30 = scalar_lea.vmem %s2767_s16, 512  ;;  %s2655_s10 = smov [#allocation5]  }
  0x23   : > { %p2497_p3 = scmp.ne.s32.totalorder %s2767_s16, %s2496_s30  ;;  %s2501_s11 = sshll.u32 %s2655_s10, 4  ;;  %s2502_s11 = int_to_ptr.vmem [resolvable:$false] %s2501_s11 }
  0x24   : > { %s2503_s12 = scalar_lea.vmem %s2502_s11, 1024  ;;  %p2504_p7 = scmp.lt.s32.totalorder %s2767_s16, %s2502_s11 }
  0x25   : > { %p2499_p4 = pnand %p2497_p3, %p3210_p8  ;;  %p2505_p9 = scmp.lt.s32.totalorder %s2503_s12, %s2496_s30 }
  0x27   : > { %p2500_p5 = pneg %p2499_p4  ;;  %p2506_p11 = por %p2505_p9, %p2504_p7 }
  0x29   : > { %p2507_p12 = pnand %p2506_p11, %p2500_p5 }
  0x2b   : > { %2510 = shalt.err (!%p2507_p12)
}
  0x2c   : > { %s2656_s15 = smov 64   ;;  %s2657_s18 = smov 4  }
  0x2d   : > { %2338 = dma.hbm_to_vmem [thread:$0]  (!%p2763_p6), %s2761_s13, 512, %s2767_s16, %s2769_s17, %s2656_s15, %s2656_s15, %s2657_s18  }
  0x2e   : > { %s2798_s19 = sadd.s32 4294967295, %s2653_s26   ;;  %p131_p10 = scmp.ne.s32.totalorder %s2637_s22, %s2633_s21 }
  0x2f   : > { %p3209_p13 = scmp.eq.s32.totalorder %s2798_s19, 0  ;;  %p2038_p0 = scmp.ge.s32.totalorder %s2653_s26, 1 }
  0x30   : > { %p220_p1 = scmp.lt.s32.totalorder %s2653_s26, 3  ;;  %s2658_s13 = smov [#allocation2]  }
  0x31   : > { %p2807_p2 = por %p3209_p13, %p131_p10  ;;  %s235_s16 = sshll.u32 %s2658_s13, 4  ;;  %s2817_s16 = int_to_ptr.vmem [resolvable:$true] %s235_s16 }
  0x32   : > { %p2811_p3 = pnand %p2038_p0, %p220_p1  ;;  %s2044_s21 = sshll.u32 %s267_s7, 4 }
  0x33   : > { %s3220_s20 = scalar_select %p2807_p2, 1, 0 }
  0x34   : > { %s3221_s28 = scalar_select %p2811_p3, 1, 0 }
  0x35   : > { %p2331_p4 = pneg %p2811_p3  ;;  %s2109_s8 = sshll.u32 %s2649_s25, 8 }
  0x36   : > { %s298_s30 = scalar_lea.vmem [#allocation7], %s2044_s21  ;;  %s2831_s15 = scalar_lea.hbm %s3205_s5, %s2109_s8 }
  0x37   : > { %p2823_p5 = pnand %p2331_p4, %p3209_p13  ;;  %s306_s10 = sshll.u32 %s298_s30, 4  ;;  %s307_s10 = int_to_ptr.vmem [resolvable:$true] %s306_s10 }
  0x38   : > { %s2511_s3 = scalar_lea.hbm %s3200_s0, 256 }
  0x39   : > { %p2512_p7 = scmp.ne.s32.totalorder %s3200_s0, %s2511_s3  ;;  %p2513_p9 = pneg %p2823_p5 }
  0x3a   : > { %p2518_p10 = scmp.lt.u32.totalorder %s2511_s3, %s3200_s0 }
  0x3b   : > { %p2514_p11 = pnand %p2513_p9, %p2512_p7 }
  0x3d   : > { %p2515_p12 = pneg %p2514_p11 }
  0x3f   : > { %p2520_p0 = pnand %p2518_p10, %p2515_p12 }
  0x41   : > { %2523 = shalt.err (!%p2520_p0)
}
  0x42   : > { %s2524_s8 = scalar_lea.vmem %s2817_s16, 256  ;;  %p2532_p8 = scmp.lt.s32.totalorder %s2817_s16, %s2817_s16 }
  0x43   : > { %p2525_p1 = scmp.ne.s32.totalorder %s2817_s16, %s2524_s8  ;;  %p2533_p2 = scmp.lt.s32.totalorder %s2524_s8, %s2524_s8 }
  0x45   : > { %p2527_p4 = pnand %p2525_p1, %p2513_p9  ;;  %p2534_p3 = por %p2533_p2, %p2532_p8 }
  0x47   : > { %p2528_p13 = pneg %p2527_p4 }
  0x49   : > { %p2535_p6 = pnand %p2534_p3, %p2528_p13 }
  0x4b   : > { %2538 = shalt.err (!%p2535_p6)
}
  0x4c   : > { %s2659_s27 = smov 128   ;;  %s2660_s3 = smov 8  }
  0x4d   : > { %2334 = dma.hbm_to_vmem [thread:$0]  (!%p2823_p5), %s3200_s0, 256, %s2817_s16, [#allocation3], %s2659_s27, %s2659_s27, %s2660_s3  }
  0x4e   : > { %s2539_s11 = scalar_lea.hbm %s2831_s15, 256  ;;  %p3223_p8 = scmp.ne.s32.totalorder %s3219_s14, 0 }
  0x4f   : > { %p2540_p7 = scmp.ne.s32.totalorder %s2831_s15, %s2539_s11  ;;  %s2544_s13 = scalar_lea.hbm %s3205_s5, 512 }
  0x50   : > { %p3224_p13 = pneg %p3223_p8  ;;  %p2545_p3 = scmp.lt.u32.totalorder %s2831_s15, %s3205_s5 }
  0x51   : > { %p2546_p9 = scmp.lt.u32.totalorder %s2544_s13, %s2539_s11  ;;  %p2548_p12 = scmp.lt.u32.totalorder %s2539_s11, %s2831_s15 }
  0x52   : > { %p2542_p6 = pnand %p2540_p7, %p3224_p13 }
  0x53   : > { %p2547_p11 = por %p2546_p9, %p2545_p3 }
  0x54   : > { %p2543_p2 = pneg %p2542_p6 }
  0x55   : > { %p2549_p10 = por %p2548_p12, %p2547_p11 }
  0x57   : > { %p2550_p5 = pnand %p2549_p10, %p2543_p2 }
  0x59   : > { %2553 = shalt.err (!%p2550_p5)
}
  0x5a   : > { %s2554_s16 = scalar_lea.vmem %s307_s10, 256  ;;  %p3225_p1 = pmov %p3224_p13 }
  0x5b   : > { %p2555_p0 = scmp.ne.s32.totalorder %s307_s10, %s2554_s16  ;;  %s2661_s29 = smov [#allocation7]  }
  0x5c   : > { %s2559_s8 = sshll.u32 %s2661_s29, 4  ;;  %s2560_s8 = int_to_ptr.vmem [resolvable:$false] %s2559_s8 }
  0x5d   : > { %p2557_p4 = pnand %p2555_p0, %p3225_p1  ;;  %s2561_s27 = scalar_lea.vmem %s2560_s8, 512 }
  0x5e   : > { %p2562_p13 = scmp.lt.s32.totalorder %s307_s10, %s2560_s8  ;;  %p2563_p6 = scmp.lt.s32.totalorder %s2561_s27, %s2554_s16 }
  0x5f   : > { %p2558_p7 = pneg %p2557_p4 }
  0x60   : > { %p2564_p3 = por %p2563_p6, %p2562_p13 }
  0x62   : > { %p2565_p9 = pnand %p2564_p3, %p2558_p7 }
  0x64   : > { %2568 = shalt.err (!%p2565_p9)
}
  0x65   : > { %2341 = dma.hbm_to_vmem [thread:$0]  (!%p3223_p8), %s2831_s15, 256, %s307_s10, %s2769_s17  }
  0x66   : > { %p3226_p2 = scmp.ne.s32.totalorder %s3221_s28, 0 }
  0x67   : > { %p3227_p11 = scmp.eq.s32.totalorder (!%p3226_p2), %s2798_s19, 0 }
  0x68   : > { %315 = sbr.rel (%p3226_p2) target bundleno = 4567 (0x11d7), region = 44 }
  0x6f   : > { %2620 = dma.done.wait (%p3227_p11), [#allocation3], 256   ;;  %p3228_p12 = pmov %p3227_p11 }
  0x70   : > { %s321_s3 = sand.u32 1, %s2798_s19   ;;  %s323_s25 = sand.u32 1, %s2637_s22  }
  0x71   : > { %2622 = vsyncadd (%p3228_p12), [#allocation3], 4294967040  ;;  %s2049_s30 = sshll.u32 %s323_s25, 5  ;;  %s322_s11 = scalar_lea.sflag [#allocation6], %s321_s3 }
  0x72   : > { %s2882_s14 = scalar_lea.vmem [#allocation5], %s2049_s30  ;;  %p3229_p10 = scmp.ne.s32.totalorder %s3220_s20, 0 }
  0x74   : > { %2624 = dma.done.wait (%p3229_p10), %s322_s11, 768  }
  0x75   : > { %2626 = vsyncadd (%p3229_p10), %s322_s11, 4294966528  ;;  %s2888_s17 = sshll.u32 %s323_s25, 4  ;;  %p379_p8 = scmp.lt.s32.totalorder %s2645_s24, 1 }
  0x76   : > { %s334_s27 = scalar_lea.vmem [#allocation7], %s2888_s17  ;;  %p2057_p5 = scmp.ne.s32.totalorder %s2645_s24, 0 }
  0x77   : > { %s380_s28 = scalar_select %p379_p8, %s2645_s24, 1 }
  0x78   : > { %399 = sbr.rel (%p2057_p5) target bundleno = 127 (0x7f), region = 60  ;;  %v400_v0 = vld [vmem:[#allocation2] sm:$0xff] (!%p2057_p5)  ;;  %vm402_vm0 = vcmask (!%p2057_p5), 523264   ;;  %v401_v1 = vld [vmem:[#allocation2 + $0x8] sm:$0xff] (!%p2057_p5) }
  0x79   : > { %s2110_s10 = sshll.u32 %s380_s28, 6  ;;  %s2111_s15 = sshll.u32 %s380_s28, 5  ;;  %403 = vst.msk [vmem:[#allocation8] sm:$0xff] (!%p2057_p5), %vm402_vm0, %v400_v0  ;;  %404 = vst.msk [vmem:[#allocation8 + $0x8] sm:$0xff] (!%p2057_p5), %vm402_vm0, %v401_v1 }
  0x7a   : > { %s383_s13 = scalar_lea.vmem %s3201_s1, %s2110_s10  ;;  %s2898_s16 = scalar_lea.vmem %s3202_s2, %s2111_s15 }
  0x7b   : > { %s2903_s8 = scalar_lea.vmem %s3204_s4, %s2110_s10 }
  0x7f PF: > { %v2413_v2 = vld [vmem:[%s383_s13 + $0x4] ss:$8 sps:$4 sm:$0xff]   ;;  %v2415_v3 = vld [vmem:[%s383_s13] ss:$8 sps:$4 sm:$0xff]   ;;  %v2662_v4 = vmov 0   ;;  %vm466_vm1 = vcmask 523264   ;;  %v418_v14 = vlaneseq }
  0x80   : > { %502 = vmatprep.mubr.bf16.mxu0 %v2662_v4  ;;  %470 = vmatprep.subr.bf16.mxu0 %v2413_v2  ;;  %v2416_v5 = vld [vmem:[%s383_s13 + $0x14] ss:$8 sps:$4 sm:$0xff]   ;;  %v2418_v6 = vld [vmem:[%s383_s13 + $0x10] ss:$8 sps:$4 sm:$0xff]   ;;  %v2419_v7 = vld [vmem:[%s383_s13 + $0x24] ss:$8 sps:$4 sm:$0xff]  }
  0x81   : > { %471 = vmatpush1.bf16.msra.mxu0 %v2415_v3  ;;  %v2421_v8 = vld [vmem:[%s383_s13 + $0x20] ss:$8 sps:$4 sm:$0xff]   ;;  %v2422_v9 = vld [vmem:[%s383_s13 + $0x34] ss:$8 sps:$4 sm:$0xff]   ;;  %v2424_v10 = vld [vmem:[%s383_s13 + $0x30] ss:$8 sps:$4 sm:$0xff]  }
  0x82   : > { %472 = vmatprep.subr.bf16.mxu0 %v2416_v5  ;;  %v2907_v11 = vld [vmem:[#allocation8] sm:$0xff]  ;;  %v2909_v12 = vld [vmem:[#allocation8 + $0x8] sm:$0xff]  ;;  %v2914_v15 = vshrl.u32 %v418_v14, 7  ;;  %v2663_v16 = vmov 0.0   ;;  %vm2664_vm2 = vmmov 0   ;;  %s2665_s24 = smov 64  }
  0x83   : > { %v409_v13 = vpack.c.bf16 %v2909_v12, %v2907_v11  ;;  %2173 = vmatprep.subr.bf16.mxu1 %v2663_v16  ;;  %v2921_v18 = vld [vmem:[%s334_s27] sm:$0xff]  ;;  %2175 = vmatprep.mubr.msk.bf16.mxu1 %vm2664_vm2, %v2663_v16  ;;  %v408_v28 = vld [vmem:[%s334_s27 + $0x8] sm:$0xff]  ;;  %vm528_vm3 = vcmask 130048   ;;  %vm652_vm4 = vcmask 1043456   ;;  %vm624_vm5 = vcmask 64512   ;;  %s2666_s3 = smov 48  }
  0x84   : > { %v420_v17 = vsub.s32 0, %v2914_v15  ;;  %s2667_s25 = smov 112   ;;  %s2668_s30 = smov 32  }
  0x85   : > { %473 = vmatpush1.bf16.msra.mxu0 %v2418_v6  ;;  %s2669_s11 = smov 96   ;;  %s2670_s17 = smov 16  }
  0x86   : > { %474 = vmatprep.subr.bf16.mxu0 %v2419_v7  ;;  %v421_v19 = vrot.slane %v2921_v18, %v420_v17  ;;  %v425_v29 = vrot.slane %v408_v28, %v420_v17  ;;  %s2671_s28 = smov 80   ;;  %p2345_p0 = scmp.eq.s32.totalorder %s2798_s19, 1 }
  0x89   : > { %475 = vmatpush1.bf16.msra.mxu0 %v2421_v8 }
  0x8a   : > { %476 = vmatprep.subr.bf16.mxu0 %v2422_v9 }
  0x8d   : > { %477 = vmatpush1.bf16.msra.mxu0 %v2424_v10 }
  0x8e   : > { %2167 = vmatprep.subr.bf16.mxu0 %v2663_v16 }
  0x90   : > { %2066 = vmatmul.mubr.msk.bf16.vlgmr.msra.gmra.mrb[0].mxu0 %vm466_vm1, %v409_v13 }
  0x91   : > { %2169 = vmatprep.mubr.msk.bf16.mxu0 %vm2664_vm2, %v2663_v16 }
 0x163   : > { %v504_v20 = vpop.f32.mrb[0].mxu0 }
 0x164   : > { %v505_v21 = vadd.f32 %v504_v20, %v421_v19  ;;  %v506_v22 = vpop.f32.mrb[1].mxu0 }
 0x165   : > { %v508_v23 = vpop.f32.mrb[2].mxu0  ;;  %v507_v31 = vadd.f32 %v506_v22, %v425_v29 }
 0x166   : > { %v2928_v24 = vpack.c.bf16 %v505_v21, %v505_v21  ;;  %v509_v25 = vadd.f32 %v508_v23, %v421_v19  ;;  %v510_v26 = vpop.f32.mrb[3].mxu0 }
 0x167   : > { %v2938_v34 = vpack.c.bf16 %v507_v31, %v507_v31  ;;  %v511_v35 = vadd.f32 %v510_v26, %v425_v29 }
 0x168   : > { %526 = vrot.lane.b32.xlu0 %v2928_v24, %s2665_s24  ;;  %v2931_v27 = vpack.c.bf16 %v509_v25, %v509_v25 }
 0x169   : > { %v2942_v37 = vpack.c.bf16 %v511_v35, %v511_v35  ;;  %v654_v38 = vsel %vm652_vm4, %v2938_v34, 0 }
 0x16b   : > { %v700_v39 = vsel %vm652_vm4, %v2942_v37, 0 }
 0x16c   : > { %576 = vrot.lane.b32.xlu0 %v2931_v27, %s2665_s24 }
 0x1da   : > { %v527_v30 = vpop.permute.xlu0 %526 }
 0x1db   : > { %v533_v32 = vsel %vm528_vm3, %v527_v30, 0 }
 0x1dc   : > { %2168 = vmatpush3.bf16.xpose.msra.mxu0 %v533_v32 }
 0x1dd   : > { %2179 = vmatprep.subr.bf16.mxu0 %v2663_v16 }
 0x1de   : > { %v577_v33 = vpop.permute.xlu0 %576 }
 0x1df   : > { %v582_v36 = vsel %vm528_vm3, %v577_v33, 0 }
 0x1e0   : > { %2174 = vmatpush3.bf16.xpose.msra.mxu1 %v582_v36 }
 0x1e1   : > { %2185 = vmatprep.subr.bf16.mxu1 %v2663_v16 }
 0x1e3   : > { %2170 = vmatmul.mubr.msk.bf16.vlgmr.msra.gmra.mrb[4].mxu0 %vm528_vm3, %v2928_v24 }
 0x1e4   : > { %2180 = vmatpush3.bf16.msra.mxu0 %v654_v38  ;;  %2181 = vmatprep.mubr.msk.bf16.mxu0 %vm2664_vm2, %v2663_v16 }
 0x1e5   : > { %2191 = vmatprep.subr.bf16.mxu0 %v2663_v16 }
 0x1e7   : > { %2176 = vmatmul.mubr.msk.bf16.vlgmr.msra.gmra.mrb[0].mxu1 %vm528_vm3, %v2931_v27 }
 0x1e8   : > { %2186 = vmatpush3.bf16.msra.mxu1 %v700_v39  ;;  %2187 = vmatprep.mubr.msk.bf16.mxu1 %vm2664_vm2, %v2663_v16 }
 0x1e9   : > { %2197 = vmatprep.subr.bf16.mxu1 %v2663_v16 }
 0x2b6   : > { %v569_v40 = vpop.f32.mrb[4].mxu0 }
 0x2b7   : > { %v2171_v41 = vpop.f32.mrb[5].mxu0  ;;  %v625_v42 = vsel %vm624_vm5, %v569_v40, -inf }
 0x2b8   : > { %626 = vmax.xlane.f32.xlu1 %v625_v42  ;;  %v572_v43 = vpop.f32.mrb[6].mxu0 }
 0x2b9   : > { %v2172_v44 = vpop.f32.mrb[7].mxu0 }
 0x2ba   : > { %v618_v45 = vpop.f32.mrb[0].mxu1 }
 0x2bb   : > { %v2177_v46 = vpop.f32.mrb[1].mxu1  ;;  %v628_v47 = vsel %vm624_vm5, %v618_v45, -inf }
 0x2bc   : > { %629 = vmax.xlane.f32.xlu1 %v628_v47  ;;  %v621_v48 = vpop.f32.mrb[2].mxu1 }
 0x2bd   : > { %v2178_v49 = vpop.f32.mrb[3].mxu1 }
 0x2cd   : > { %745 = vrot.lane.b32.xlu1 %v2928_v24, %s2666_s3 }
 0x2d1   : > { %795 = vrot.lane.b32.xlu1 %v2931_v27, %s2666_s3 }
 0x345   : > { %v627_v50 = vpop.xlane.xlu1 %626 }
 0x346   : > { %v631_v51 = vsub.f32 %v569_v40, %v627_v50 }
 0x348   : > { %v633_v52 = vmul.f32 1.442695, %v631_v51 }
 0x349   : > { %v630_v53 = vpop.xlane.xlu1 %629 }
 0x34a   : > { %2441 = vpow2.f32 %v633_v52  ;;  %v632_v54 = vsub.f32 %v618_v45, %v630_v53 }
 0x34c   : > { %v635_v55 = vmul.f32 1.442695, %v632_v54 }
 0x34d   : > { %v746_v60 = vpop.permute.xlu1 %745 }
 0x34e   : > { %2443 = vpow2.f32 %v635_v55  ;;  %v751_v4 = vsel %vm528_vm3, %v746_v60, 0  ;;  %v2425_v60 = vld [vmem:[%s2898_s16] sm:$0xff]  }
 0x351   : > { %v796_v61 = vpop.permute.xlu1 %795 }
 0x352   : > { %v801_v7 = vsel %vm528_vm3, %v796_v61, 0 }
 0x354   : > { %v2442_v56 = vpop.eup %2441 }
 0x355   : > { %v637_v57 = vsel %vm624_vm5, %v2442_v56, 0.0 }
 0x356   : > { %638 = vadd.xlane.f32.xlu0 %v637_v57 }
 0x358   : > { %v2444_v58 = vpop.eup %2443 }
 0x359   : > { %v640_v59 = vsel %vm624_vm5, %v2444_v58, 0.0 }
 0x35a   : > { %641 = vadd.xlane.f32.xlu1 %v640_v59 }
 0x36b   : > { %743 = vrot.lane.b32.xlu1 %v2928_v24, %s2667_s25 }
 0x36f   : > { %793 = vrot.lane.b32.xlu1 %v2931_v27, %s2667_s25 }
 0x3e3   : > { %v639_v62 = vpop.xlane.xlu0 %638 }
 0x3e4   : > { %2445 = vrcp.f32 %v639_v62 }
 0x3e7   : > { %v642_v63 = vpop.xlane.xlu1 %641 }
 0x3e8   : > { %2447 = vrcp.f32 %v642_v63 }
 0x3eb   : > { %v744_v8 = vpop.permute.xlu1 %743 }
 0x3ee   : > { %v2446_v0 = vpop.eup %2445 }
 0x3ef   : > { %v645_v1 = vmul.f32 %v2446_v0, %v2442_v56  ;;  %v794_v9 = vpop.permute.xlu1 %793  ;;  %v2426_v56 = vld [vmem:[%s2898_s16 + $0x8] sm:$0xff]  }
 0x3f1   : > { %v647_v2 = vpack.c.bf16 %v645_v1, %v645_v1 }
 0x3f2   : > { %v2448_v3 = vpop.eup %2447 }
 0x3f3   : > { %v646_v5 = vmul.f32 %v2448_v3, %v2444_v58  ;;  %2182 = vmatmul.mubr.msk.bf16.vlgmr.msra.gmra.mrb[8].mxu0 %vm624_vm5, %v647_v2 }
 0x3f4   : > { %2192 = vmatpush3.bf16.xpose.msra.mxu0 %v751_v4  ;;  %2193 = vmatprep.mubr.msk.bf16.mxu0 %vm2664_vm2, %v2663_v16 }
 0x3f5   : > { %v648_v6 = vpack.c.bf16 %v646_v5, %v646_v5  ;;  %2203 = vmatprep.subr.bf16.mxu0 %v2663_v16 }
 0x3f7   : > { %2188 = vmatmul.mubr.msk.bf16.vlgmr.msra.gmra.mrb[4].mxu1 %vm624_vm5, %v648_v6 }
 0x3f8   : > { %2198 = vmatpush3.bf16.xpose.msra.mxu1 %v801_v7  ;;  %2199 = vmatprep.mubr.msk.bf16.mxu1 %vm2664_vm2, %v2663_v16 }
 0x3f9   : > { %2209 = vmatprep.subr.bf16.mxu1 %v2663_v16 }
 0x3fb   : > { %2194 = vmatmul.mubr.msk.bf16.vlgmr.msra.gmra.mrb[12].mxu0 %vm528_vm3, %v744_v8 }
 0x3fc   : > { %2205 = vmatprep.mubr.msk.bf16.mxu0 %vm2664_vm2, %v2663_v16 }
 0x3ff   : > { %2200 = vmatmul.mubr.msk.bf16.vlgmr.msra.gmra.mrb[8].mxu1 %vm528_vm3, %v794_v9 }
 0x400   : > { %2211 = vmatprep.mubr.msk.bf16.mxu1 %vm2664_vm2, %v2663_v16 }
 0x4c6   : > { %v2984_v10 = vpop.f32.mrb[8].mxu0 }
 0x4c7   : > { %v2183_v13 = vpop.f32.mrb[9].mxu0 }
 0x4c8   : > { %v693_v14 = vpop.f32.mrb[10].mxu0 }
 0x4c9   : > { %v2184_v17 = vpop.f32.mrb[11].mxu0 }
 0x4ca   : > { %v2986_v19 = vpop.f32.mrb[4].mxu1 }
 0x4cb   : > { %v742_v20 = vpack.c.bf16 %v2986_v19, %v2984_v10  ;;  %v2189_v21 = vpop.f32.mrb[5].mxu1 }
 0x4cc   : > { %v739_v22 = vpop.f32.mrb[6].mxu1 }
 0x4cd   : > { %v2190_v23 = vpop.f32.mrb[7].mxu1 }
 0x4ce   : > { %v787_v25 = vpop.f32.mrb[12].mxu0 }
 0x4cf   : > { %v2195_v26 = vpop.f32.mrb[13].mxu0  ;;  %v843_v28 = vsel %vm624_vm5, %v787_v25, -inf }
 0x4d0   : > { %844 = vmax.xlane.f32.xlu0 %v843_v28  ;;  %v790_v29 = vpop.f32.mrb[14].mxu0 }
 0x4d1   : > { %v2196_v30 = vpop.f32.mrb[15].mxu0 }
 0x4d2   : > { %v837_v31 = vpop.f32.mrb[8].mxu1 }
 0x4d3   : > { %v2201_v32 = vpop.f32.mrb[9].mxu1  ;;  %v846_v33 = vsel %vm624_vm5, %v837_v31, -inf }
 0x4d4   : > { %847 = vmax.xlane.f32.xlu1 %v846_v33  ;;  %v840_v35 = vpop.f32.mrb[10].mxu1 }
 0x4d5   : > { %v2202_v36 = vpop.f32.mrb[11].mxu1 }
 0x4e5   : > { %1118 = vrot.lane.b32.xlu1 %v2931_v27, %s2668_s30 }
 0x4e6   : > { %868 = vrot.lane.b32.xlu0 %v2938_v34, %s2667_s25 }
 0x55d   : > { %v845_v38 = vpop.xlane.xlu0 %844 }
 0x55e   : > { %v849_v39 = vsub.f32 %v787_v25, %v845_v38 }
 0x560   : > { %v851_v40 = vmul.f32 1.442695, %v849_v39 }
 0x561   : > { %v848_v41 = vpop.xlane.xlu1 %847  ;;  %v869_v42 = vpop.permute.xlu0 %868 }
 0x562   : > { %2449 = vpow2.f32 %v851_v40  ;;  %v850_v43 = vsub.f32 %v837_v31, %v848_v41  ;;  %v874_v44 = vsel %vm652_vm4, %v869_v42, 0 }
 0x563   : > { %2204 = vmatpush3.bf16.msra.mxu0 %v874_v44 }
 0x564   : > { %v853_v45 = vmul.f32 1.442695, %v850_v43  ;;  %2215 = vmatprep.subr.bf16.mxu0 %v2663_v16 }
 0x565   : > { %v1119_v63 = vpop.permute.xlu1 %1118 }
 0x566   : > { %2451 = vpow2.f32 %v853_v45  ;;  %v1124_v0 = vsel %vm528_vm3, %v1119_v63, 0 }
 0x56c   : > { %v2450_v46 = vpop.eup %2449 }
 0x56d   : > { %v855_v47 = vsel %vm624_vm5, %v2450_v46, 0.0 }
 0x56e   : > { %856 = vadd.xlane.f32.xlu0 %v855_v47 }
 0x570   : > { %v2452_v48 = vpop.eup %2451 }
 0x571   : > { %v858_v49 = vsel %vm624_vm5, %v2452_v48, 0.0 }
 0x572   : > { %859 = vadd.xlane.f32.xlu0 %v858_v49 }
 0x588   : > { %917 = vrot.lane.b32.xlu0 %v2942_v37, %s2667_s25 }
 0x58c   : > { %1068 = vrot.lane.b32.xlu0 %v2928_v24, %s2668_s30 }
 0x590   : > { %1066 = vrot.lane.b32.xlu0 %v2928_v24, %s2669_s11 }
 0x594   : > { %1116 = vrot.lane.b32.xlu0 %v2931_v27, %s2669_s11 }
 0x5fb   : > { %v857_v50 = vpop.xlane.xlu0 %856 }
 0x5fc   : > { %2453 = vrcp.f32 %v857_v50 }
 0x5ff   : > { %v860_v51 = vpop.xlane.xlu0 %859 }
 0x600   : > { %2455 = vrcp.f32 %v860_v51 }
 0x603   : > { %v918_v52 = vpop.permute.xlu0 %917 }
 0x604   : > { %v923_v53 = vsel %vm652_vm4, %v918_v52, 0 }
 0x605   : > { %2210 = vmatpush3.bf16.msra.mxu1 %v923_v53 }
 0x606   : > { %v2454_v54 = vpop.eup %2453  ;;  %2221 = vmatprep.subr.bf16.mxu1 %v2663_v16 }
 0x607   : > { %v863_v55 = vmul.f32 %v2454_v54, %v2450_v46  ;;  %v1069_v62 = vpop.permute.xlu0 %1068 }
 0x608   : > { %v1074_v13 = vsel %vm528_vm3, %v1069_v62, 0 }
 0x609   : > { %v865_v57 = vpack.c.bf16 %v863_v55, %v863_v55 }
 0x60a   : > { %v2456_v58 = vpop.eup %2455 }
 0x60b   : > { %v864_v59 = vmul.f32 %v2456_v58, %v2452_v48  ;;  %2206 = vmatmul.mubr.msk.bf16.vlgmr.msra.gmra.mrb[16].mxu0 %vm624_vm5, %v865_v57  ;;  %v1067_v1 = vpop.permute.xlu0 %1066 }
 0x60c   : > { %2216 = vmatpush3.bf16.msra.mxu0 %v2426_v56  ;;  %2217 = vmatprep.mubr.msk.bf16.mxu0 %vm2664_vm2, %v2663_v16 }
 0x60d   : > { %v866_v61 = vpack.c.bf16 %v864_v59, %v864_v59  ;;  %2227 = vmatprep.subr.bf16.mxu0 %v2663_v16 }
 0x60f   : > { %2212 = vmatmul.mubr.msk.bf16.vlgmr.msra.gmra.mrb[12].mxu1 %vm624_vm5, %v866_v61  ;;  %v1117_v2 = vpop.permute.xlu0 %1116 }
 0x610   : > { %2222 = vmatpush3.bf16.msra.mxu1 %v2425_v60  ;;  %2223 = vmatprep.mubr.msk.bf16.mxu1 %vm2664_vm2, %v2663_v16 }
 0x611   : > { %2233 = vmatprep.subr.bf16.mxu1 %v2663_v16 }
 0x617   : > { %2224 = vmatmul.mubr.msk.bf16.vlgmr.msra.gmra.mrb[16].mxu1 %vm528_vm3, %v742_v20 }
 0x618   : > { %2235 = vmatprep.mubr.msk.bf16.mxu1 %vm2664_vm2, %v2663_v16 }
 0x619   : > { %2234 = vmatpush3.bf16.xpose.msra.mxu1 %v1124_v0 }
 0x61a   : > { %2245 = vmatprep.subr.bf16.mxu1 %v2663_v16 }
 0x620   : > { %2236 = vmatmul.mubr.msk.bf16.vlgmr.msra.gmra.mrb[20].mxu1 %vm528_vm3, %v1117_v2 }
 0x621   : > { %2247 = vmatprep.mubr.msk.bf16.mxu1 %vm2664_vm2, %v2663_v16 }
 0x6de   : > { %v910_v3 = vpop.f32.mrb[16].mxu0 }
 0x6df   : > { %v2207_v4 = vpop.f32.mrb[17].mxu0 }
 0x6e0   : > { %v913_v5 = vpop.f32.mrb[18].mxu0 }
 0x6e1   : > { %v2208_v6 = vpop.f32.mrb[19].mxu0 }
 0x6e2   : > { %v959_v7 = vpop.f32.mrb[12].mxu1 }
 0x6e3   : > { %v965_v8 = vpack.c.bf16 %v959_v7, %v910_v3  ;;  %v2213_v9 = vpop.f32.mrb[13].mxu1 }
 0x6e4   : > { %v962_v10 = vpop.f32.mrb[14].mxu1 }
 0x6e5   : > { %v2214_v14 = vpop.f32.mrb[15].mxu1  ;;  %2218 = vmatmul.mubr.msk.bf16.vlgmr.msra.gmra.mrb[20].mxu0 %vm528_vm3, %v965_v8 }
 0x6e6   : > { %2228 = vmatpush3.bf16.xpose.msra.mxu0 %v1074_v13  ;;  %2229 = vmatprep.mubr.msk.bf16.mxu0 %vm2664_vm2, %v2663_v16 }
 0x6e7   : > { %2239 = vmatprep.subr.bf16.mxu0 %v2663_v16 }
 0x6ea   : > { %v1059_v17 = vpop.f32.mrb[16].mxu1 }
 0x6eb   : > { %v2225_v19 = vpop.f32.mrb[17].mxu1 }
 0x6ec   : > { %v1062_v20 = vpop.f32.mrb[18].mxu1 }
 0x6ed   : > { %v2226_v21 = vpop.f32.mrb[19].mxu1  ;;  %2230 = vmatmul.mubr.msk.bf16.vlgmr.msra.gmra.mrb[24].mxu0 %vm528_vm3, %v1067_v1  ;;  %v2427_v1 = vld [vmem:[%s2898_s16 + $0x10] sm:$0xff]  }
 0x6ee   : > { %2241 = vmatprep.mubr.msk.bf16.mxu0 %vm2664_vm2, %v2663_v16 }
 0x6f3   : > { %v1160_v22 = vpop.f32.mrb[20].mxu1 }
 0x6f4   : > { %v2237_v23 = vpop.f32.mrb[21].mxu1  ;;  %v1169_v25 = vsel %vm624_vm5, %v1160_v22, -inf }
 0x6f5   : > { %1170 = vmax.xlane.f32.xlu1 %v1169_v25  ;;  %v1163_v26 = vpop.f32.mrb[22].mxu1 }
 0x6f6   : > { %v2238_v28 = vpop.f32.mrb[23].mxu1 }
 0x706   : > { %1238 = vrot.lane.b32.xlu1 %v2942_v37, %s2669_s11 }
 0x70a   : > { %1341 = vrot.lane.b32.xlu1 %v2928_v24, %s2670_s17 }
 0x70e   : > { %1339 = vrot.lane.b32.xlu1 %v2928_v24, %s2671_s28 }
 0x782   : > { %v1171_v29 = vpop.xlane.xlu1 %1170 }
 0x783   : > { %v1173_v32 = vsub.f32 %v1160_v22, %v1171_v29 }
 0x785   : > { %v1176_v33 = vmul.f32 1.442695, %v1173_v32 }
 0x786   : > { %v1239_v30 = vpop.permute.xlu1 %1238 }
 0x787   : > { %v1244_v31 = vsel %vm652_vm4, %v1239_v30, 0  ;;  %2457 = vpow2.f32 %v1176_v33 }
 0x788   : > { %2246 = vmatpush3.bf16.msra.mxu1 %v1244_v31 }
 0x789   : > { %2257 = vmatprep.subr.bf16.mxu1 %v2663_v16 }
 0x78a   : > { %v1342_v56 = vpop.permute.xlu1 %1341 }
 0x78b   : > { %v1347_v58 = vsel %vm528_vm3, %v1342_v56, 0 }
 0x78e   : > { %v1340_v59 = vpop.permute.xlu1 %1339 }
 0x791   : > { %v2458_v44 = vpop.eup %2457 }
 0x792   : > { %v1181_v47 = vsel %vm624_vm5, %v2458_v44, 0.0 }
 0x7b8   : > { %v1009_v35 = vpop.f32.mrb[20].mxu0 }
 0x7b9   : > { %v3046_v36 = vadd.f32 %v1059_v17, %v1009_v35  ;;  %v2219_v38 = vpop.f32.mrb[21].mxu0 }
 0x7ba   : > { %v1012_v39 = vpop.f32.mrb[22].mxu0 }
 0x7bb   : > { %v3048_v40 = vadd.f32 %v1062_v20, %v1012_v39  ;;  %v2220_v41 = vpop.f32.mrb[23].mxu0 }
 0x7c0   : > { %v1110_v42 = vpop.f32.mrb[24].mxu0 }
 0x7c1   : > { %v2231_v24 = vpop.f32.mrb[25].mxu0  ;;  %v1166_v43 = vsel %vm624_vm5, %v1110_v42, -inf }
 0x7c2   : > { %1167 = vmax.xlane.f32.xlu0 %v1166_v43  ;;  %v1113_v45 = vpop.f32.mrb[26].mxu0 }
 0x7c3   : > { %v2232_v46 = vpop.f32.mrb[27].mxu0 }
 0x7c6   : > { %1182 = vadd.xlane.f32.xlu0 %v1181_v47 }
 0x84f   : > { %v1168_v48 = vpop.xlane.xlu0 %1167 }
 0x850   : > { %v1172_v49 = vsub.f32 %v1110_v42, %v1168_v48 }
 0x852   : > { %v1174_v50 = vmul.f32 1.442695, %v1172_v49 }
 0x853   : > { %v1183_v51 = vpop.xlane.xlu0 %1182 }
 0x854   : > { %2459 = vpow2.f32 %v1174_v50 }
 0x855   : > { %2461 = vrcp.f32 %v1183_v51 }
 0x85e   : > { %v2460_v52 = vpop.eup %2459 }
 0x85f   : > { %v2462_v53 = vpop.eup %2461  ;;  %v1178_v54 = vsel %vm624_vm5, %v2460_v52, 0.0 }
 0x860   : > { %v1187_v55 = vmul.f32 %v2462_v53, %v2458_v44  ;;  %1179 = vadd.xlane.f32.xlu0 %v1178_v54  ;;  %v2428_v53 = vld [vmem:[%s2898_s16 + $0x18] sm:$0xff]  }
 0x862   : > { %v1189_v57 = vpack.c.bf16 %v1187_v55, %v1187_v55 }
 0x864   : > { %2248 = vmatmul.mubr.msk.bf16.vlgmr.msra.gmra.mrb[24].mxu1 %vm624_vm5, %v1189_v57 }
 0x865   : > { %2258 = vmatpush3.bf16.xpose.msra.mxu1 %v1347_v58  ;;  %2259 = vmatprep.mubr.msk.bf16.mxu1 %vm2664_vm2, %v2663_v16 }
 0x866   : > { %2269 = vmatprep.subr.bf16.mxu1 %v2663_v16 }
 0x86c   : > { %2260 = vmatmul.mubr.msk.bf16.vlgmr.msra.gmra.mrb[28].mxu1 %vm528_vm3, %v1340_v59 }
 0x86d   : > { %2271 = vmatprep.mubr.msk.bf16.mxu1 %vm2664_vm2, %v2663_v16 }
 0x876   : > { %1190 = vrot.lane.b32.xlu0 %v2938_v34, %s2669_s11 }
 0x87a   : > { %1391 = vrot.lane.b32.xlu0 %v2931_v27, %s2670_s17 }
 0x87e   : > { %1389 = vrot.lane.b32.xlu0 %v2931_v27, %s2671_s28 }
 0x8ed   : > { %v1180_v60 = vpop.xlane.xlu0 %1179 }
 0x8ee   : > { %2463 = vrcp.f32 %v1180_v60 }
 0x8f1   : > { %v1191_v61 = vpop.permute.xlu0 %1190 }
 0x8f2   : > { %v1196_v62 = vsel %vm652_vm4, %v1191_v61, 0 }
 0x8f3   : > { %2240 = vmatpush3.bf16.msra.mxu0 %v1196_v62 }
 0x8f4   : > { %2251 = vmatprep.subr.bf16.mxu0 %v2663_v16 }
 0x8f5   : > { %v1392_v13 = vpop.permute.xlu0 %1391 }
 0x8f6   : > { %v1397_v21 = vsel %vm528_vm3, %v1392_v13, 0 }
 0x8f8   : > { %v2464_v63 = vpop.eup %2463 }
 0x8f9   : > { %v1186_v0 = vmul.f32 %v2464_v63, %v2460_v52  ;;  %v1390_v23 = vpop.permute.xlu0 %1389 }
 0x8fb   : > { %v1188_v2 = vpack.c.bf16 %v1186_v0, %v1186_v0 }
 0x8fd   : > { %2242 = vmatmul.mubr.msk.bf16.vlgmr.msra.gmra.mrb[28].mxu0 %vm624_vm5, %v1188_v2 }
 0x8fe   : > { %2252 = vmatpush3.bf16.msra.mxu0 %v2427_v1  ;;  %2253 = vmatprep.mubr.msk.bf16.mxu0 %vm2664_vm2, %v2663_v16 }
 0x8ff   : > { %2263 = vmatprep.subr.bf16.mxu0 %v2663_v16 }
 0x937   : > { %v1280_v27 = vpop.f32.mrb[24].mxu1 }
 0x938   : > { %v2249_v3 = vpop.f32.mrb[25].mxu1 }
 0x939   : > { %v1283_v4 = vpop.f32.mrb[26].mxu1  ;;  %v1616_v3 = vsub.s32 1, %v2914_v15 }
 0x93a   : > { %v2250_v5 = vpop.f32.mrb[27].mxu1 }
 0x93f   : > { %v1383_v6 = vpop.f32.mrb[28].mxu1 }
 0x940   : > { %v2261_v7 = vpop.f32.mrb[29].mxu1  ;;  %v1439_v8 = vsel %vm624_vm5, %v1383_v6, -inf }
 0x941   : > { %1440 = vmax.xlane.f32.xlu1 %v1439_v8  ;;  %v1386_v9 = vpop.f32.mrb[30].mxu1  ;;  %v1617_v7 = vrot.slane %v2921_v18, %v1616_v3 }
 0x942   : > { %v2262_v10 = vpop.f32.mrb[31].mxu1 }
 0x9ce   : > { %v1441_v25 = vpop.xlane.xlu1 %1440 }
 0x9cf   : > { %v1445_v26 = vsub.f32 %v1383_v6, %v1441_v25 }
 0x9d0   : > { %v1232_v14 = vpop.f32.mrb[28].mxu0 }
 0x9d1   : > { %v1286_v17 = vpack.c.bf16 %v1280_v27, %v1232_v14  ;;  %v2243_v19 = vpop.f32.mrb[29].mxu0  ;;  %v1447_v28 = vmul.f32 1.442695, %v1445_v26 }
 0x9d2   : > { %v1235_v20 = vpop.f32.mrb[30].mxu0 }
 0x9d3   : > { %v2244_v22 = vpop.f32.mrb[31].mxu0  ;;  %2254 = vmatmul.mubr.msk.bf16.vlgmr.msra.gmra.mrb[32].mxu0 %vm528_vm3, %v1286_v17  ;;  %2465 = vpow2.f32 %v1447_v28 }
 0x9d4   : > { %2264 = vmatpush3.bf16.xpose.msra.mxu0 %v1397_v21  ;;  %2265 = vmatprep.mubr.msk.bf16.mxu0 %vm2664_vm2, %v2663_v16 }
 0x9d5   : > { %2275 = vmatprep.subr.bf16.mxu0 %v2663_v16 }
 0x9db   : > { %2266 = vmatmul.mubr.msk.bf16.vlgmr.msra.gmra.mrb[36].mxu0 %vm528_vm3, %v1390_v23 }
 0x9dc   : > { %2277 = vmatprep.mubr.msk.bf16.mxu0 %vm2664_vm2, %v2663_v16 }
 0x9dd   : > { %v2466_v42 = vpop.eup %2465 }
 0x9de   : > { %v1451_v44 = vsel %vm624_vm5, %v2466_v42, 0.0 }
 0xaa6   : > { %v1330_v29 = vpop.f32.mrb[32].mxu0 }
 0xaa7   : > { %v1337_v30 = vadd.f32 %v1330_v29, %v3046_v36  ;;  %v2255_v31 = vpop.f32.mrb[33].mxu0 }
 0xaa8   : > { %v1333_v32 = vpop.f32.mrb[34].mxu0 }
 0xaa9   : > { %v3085_v33 = vadd.f32 %v1333_v32, %v3048_v40  ;;  %v2256_v35 = vpop.f32.mrb[35].mxu0  ;;  %v2429_v32 = vld [vmem:[%s2882_s14] sm:$0xff]  }
 0xaaa   : > { %v2431_v35 = vld [vmem:[%s2882_s14 + $0x10] sm:$0xff]  }
 0xaae   : > { %v1433_v38 = vpop.f32.mrb[36].mxu0 }
 0xaaf   : > { %v2267_v39 = vpop.f32.mrb[37].mxu0  ;;  %v1442_v41 = vsel %vm624_vm5, %v1433_v38, -inf }
 0xab0   : > { %1443 = vmax.xlane.f32.xlu0 %v1442_v41  ;;  %v1436_v24 = vpop.f32.mrb[38].mxu0  ;;  %v2433_v39 = vld [vmem:[%s2903_s8] sm:$0xff]   ;;  %v2434_v41 = vld [vmem:[%s2903_s8 + $0x8] sm:$0xff]  }
 0xab1   : > { %v2268_v43 = vpop.f32.mrb[39].mxu0  ;;  %v2436_v24 = vld [vmem:[%s2903_s8 + $0x18] sm:$0xff]  }
 0xab2   : > { %v2437_v43 = vld [vmem:[%s2903_s8 + $0x20] sm:$0xff]  }
 0xab4   : > { %1452 = vadd.xlane.f32.xlu0 %v1451_v44  ;;  %v2438_v44 = vld [vmem:[%s2903_s8 + $0x28] sm:$0xff]  }
 0xaca   : > { %1463 = vrot.lane.b32.xlu0 %v2938_v34, %s2671_s28 }
 0xb3d   : > { %v1444_v36 = vpop.xlane.xlu0 %1443 }
 0xb3e   : > { %v1446_v45 = vsub.f32 %v1433_v38, %v1444_v36  ;;  %v2432_v38 = vld [vmem:[%s2882_s14 + $0x18] sm:$0xff]  }
 0xb40   : > { %v1449_v46 = vmul.f32 1.442695, %v1446_v45 }
 0xb41   : > { %v1453_v40 = vpop.xlane.xlu0 %1452 }
 0xb42   : > { %2467 = vpow2.f32 %v1449_v46 }
 0xb43   : > { %2469 = vrcp.f32 %v1453_v40 }
 0xb45   : > { %v1464_v47 = vpop.permute.xlu0 %1463 }
 0xb46   : > { %v1469_v48 = vsel %vm652_vm4, %v1464_v47, 0 }
 0xb47   : > { %2270 = vmatpush3.bf16.msra.mxu1 %v1469_v48 }
 0xb48   : > { %2281 = vmatprep.subr.bf16.mxu1 %v2663_v16 }
 0xb4c   : > { %v2468_v49 = vpop.eup %2467 }
 0xb4d   : > { %v2470_v50 = vpop.eup %2469  ;;  %v1454_v51 = vsel %vm624_vm5, %v2468_v49, 0.0 }
 0xb4e   : > { %v1459_v52 = vmul.f32 %v2470_v50, %v2466_v42  ;;  %1455 = vadd.xlane.f32.xlu1 %v1454_v51  ;;  %v2435_v42 = vld [vmem:[%s2903_s8 + $0x10] sm:$0xff]   ;;  %v1655_v51 = vsub.s32 3, %v2914_v15 }
 0xb50   : > { %v1461_v34 = vpack.c.bf16 %v1459_v52, %v1459_v52 }
 0xb52   : > { %2272 = vmatmul.mubr.msk.bf16.vlgmr.msra.gmra.mrb[32].mxu1 %vm624_vm5, %v1461_v34 }
 0xb53   : > { %2283 = vmatprep.mubr.msk.bf16.mxu1 %vm2664_vm2, %v2663_v16  ;;  %2282 = vmatpush3.bf16.msra.mxu1 %v2428_v53 }
 0xb54   : > { %2299 = vmatprep.subr.bf16.mxu1 %v2663_v16 }
 0xb5f   : > { %1511 = vrot.lane.b32.xlu1 %v2942_v37, %s2671_s28 }
 0xbdb   : > { %v1456_v54 = vpop.xlane.xlu1 %1455 }
 0xbdc   : > { %2471 = vrcp.f32 %v1456_v54 }
 0xbdf   : > { %v1512_v55 = vpop.permute.xlu1 %1511 }
 0xbe0   : > { %v1517_v56 = vsel %vm652_vm4, %v1512_v55, 0 }
 0xbe1   : > { %2276 = vmatpush3.bf16.msra.mxu0 %v1517_v56  ;;  %v1656_v56 = vrot.slane %v2921_v18, %v1655_v51 }
 0xbe2   : > { %2287 = vmatprep.subr.bf16.mxu0 %v2663_v16 }
 0xbe6   : > { %v2472_v57 = vpop.eup %2471 }
 0xbe7   : > { %v1460_v58 = vmul.f32 %v2472_v57, %v2468_v49  ;;  %v1649_v49 = vsub.s32 2, %v2914_v15 }
 0xbe9   : > { %v1462_v59 = vpack.c.bf16 %v1460_v58, %v1460_v58  ;;  %v1650_v50 = vrot.slane %v2921_v18, %v1649_v49 }
 0xbeb   : > { %2278 = vmatmul.mubr.msk.bf16.vlgmr.msra.gmra.mrb[40].mxu0 %vm624_vm5, %v1462_v59 }
 0xbec   : > { %2295 = vmatprep.mubr.msk.bf16.mxu0 %vm2664_vm2, %v2663_v16  ;;  %2288 = vmatpush3.bf16.msra.mxu0 %v2429_v32 }
 0xbed   : > { %2289 = vmatprep.subr.bf16.mxu0 %v2663_v16 }
 0xc25   : > { %v1505_v37 = vpop.f32.mrb[32].mxu1 }
 0xc26   : > { %v2273_v60 = vpop.f32.mrb[33].mxu1 }
 0xc27   : > { %v1508_v61 = vpop.f32.mrb[34].mxu1  ;;  %v2439_v60 = vld [vmem:[%s2903_s8 + $0x30] sm:$0xff]  }
 0xc28   : > { %v2274_v62 = vpop.f32.mrb[35].mxu1  ;;  %v2440_v61 = vld [vmem:[%s2903_s8 + $0x38] sm:$0xff]  }
 0xc29   : > { %v1670_v62 = vsub.s32 4, %v2914_v15 }
 0xcbe   : > { %v1553_v63 = vpop.f32.mrb[40].mxu0 }
 0xcbf   : > { %v1559_v0 = vpack.c.bf16 %v1553_v63, %v1505_v37  ;;  %v2279_v1 = vpop.f32.mrb[41].mxu0  ;;  %v1671_v63 = vrot.slane %v2921_v18, %v1670_v62 }
 0xcc0   : > { %v1556_v2 = vpop.f32.mrb[42].mxu0 }
 0xcc1   : > { %v2280_v27 = vpop.f32.mrb[43].mxu0  ;;  %2284 = vmatmul.mubr.msk.bf16.vlgmr.msra.gmra.mrb[36].mxu1 %vm528_vm3, %v1559_v0 }
 0xcc2   : > { %2315 = vmatprep.mubr.msk.bf16.mxu1 %vm2664_vm2, %v2663_v16  ;;  %2300 = vmatpush3.bf16.msra.mxu1 %v2433_v39 }
 0xcc3   : > { %2301 = vmatprep.subr.bf16.mxu1 %v2663_v16 }
 0xcc6   : > { %2302 = vmatpush3.bf16.msra.mxu1 %v2434_v41 }
 0xcc7   : > { %2303 = vmatprep.subr.bf16.mxu1 %v2663_v16 }
 0xcca   : > { %2304 = vmatpush3.bf16.msra.mxu1 %v2435_v42 }
 0xccb   : > { %2305 = vmatprep.subr.bf16.mxu1 %v2663_v16 }
 0xcce   : > { %2306 = vmatpush3.bf16.msra.mxu1 %v2436_v24 }
 0xccf   : > { %2307 = vmatprep.subr.bf16.mxu1 %v2663_v16 }
 0xcd2   : > { %2308 = vmatpush3.bf16.msra.mxu1 %v2437_v43  ;;  %v1882_v43 = vsub.s32 6, %v2914_v15 }
 0xcd3   : > { %2309 = vmatprep.subr.bf16.mxu1 %v2663_v16 }
 0xcd6   : > { %2310 = vmatpush3.bf16.msra.mxu1 %v2438_v44  ;;  %v1888_v44 = vsub.s32 7, %v2914_v15 }
 0xcd7   : > { %2311 = vmatprep.subr.bf16.mxu1 %v2663_v16 }
 0xcda   : > { %2312 = vmatpush3.bf16.msra.mxu1 %v2439_v60 }
 0xcdb   : > { %2313 = vmatprep.subr.bf16.mxu1 %v2663_v16 }
 0xcde   : > { %2314 = vmatpush3.bf16.msra.mxu1 %v2440_v61 }
 0xd94   : > { %v1603_v4 = vpop.f32.mrb[36].mxu1 }
 0xd95   : > { %v1610_v5 = vadd.f32 %v1603_v4, %v1337_v30  ;;  %v2285_v6 = vpop.f32.mrb[37].mxu1 }
 0xd96   : > { %v1606_v8 = vpop.f32.mrb[38].mxu1 }
 0xd97   : > { %v1612_v9 = vadd.f32 %v1610_v5, %v2907_v11  ;;  %v1611_v10 = vadd.f32 %v1606_v8, %v3085_v33  ;;  %v2286_v13 = vpop.f32.mrb[39].mxu1  ;;  %v2430_v33 = vld [vmem:[%s2882_s14 + $0x8] sm:$0xff]   ;;  %v1761_v8 = vsub.s32 5, %v2914_v15  ;;  %s2672_s14 = smov [#allocation8]  }
 0xd98   : > { %2290 = vmatpush3.bf16.msra.mxu0 %v2430_v33  ;;  %s1903_s10 = sshll.u32 %s2672_s14, 4  ;;  %s1904_s10 = int_to_ptr.vmem [resolvable:$true] %s1903_s10 }
 0xd99   : > { %v1613_v14 = vadd.f32 %v1611_v10, %v2909_v12  ;;  %v1618_v17 = vadd.f32 %v1617_v7, %v1612_v9  ;;  %2291 = vmatprep.subr.bf16.mxu0 %v2663_v16  ;;  %s2569_s15 = scalar_lea.vmem %s1904_s10, 256  ;;  %p2576_p13 = scmp.lt.s32.totalorder %s1904_s10, %s1904_s10 }
 0xd9a   : > { %p2570_p1 = scmp.ne.s32.totalorder %s1904_s10, %s2569_s15  ;;  %p2577_p6 = scmp.lt.s32.totalorder %s2569_s15, %s2569_s15 }
 0xd9b   : > { %v1620_v19 = vsel %vm466_vm1, %v1618_v17, 0.0  ;;  %v1619_v20 = vadd.f32 %v1617_v7, %v1613_v14 }
 0xd9c   : > { %1621 = vadd.xlane.f32.xlu1 %v1620_v19  ;;  %2292 = vmatpush3.bf16.msra.mxu0 %v2431_v35  ;;  %p2571_p4 = pnand %p2570_p1, %p2345_p0  ;;  %p2578_p3 = por %p2577_p6, %p2576_p13 }
 0xd9d   : > { %v1623_v21 = vsel %vm466_vm1, %v1619_v20, 0.0  ;;  %2293 = vmatprep.subr.bf16.mxu0 %v2663_v16  ;;  %v1762_v16 = vrot.slane %v2921_v18, %v1761_v8 }
 0xd9e   : > { %1624 = vadd.xlane.f32.xlu0 %v1623_v21  ;;  %p2572_p7 = pneg %p2571_p4 }
 0xda0   : > { %2294 = vmatpush3.bf16.msra.mxu0 %v2432_v38  ;;  %p2579_p9 = pnand %p2578_p3, %p2572_p7 }
 0xe29   : > { %v1622_v22 = vpop.xlane.xlu1 %1621 }
 0xe2a   : > { %v1627_v23 = vmul.f32 0.015625, %v1622_v22 }
 0xe2b   : > { %v1625_v25 = vpop.xlane.xlu0 %1624 }
 0xe2c   : > { %v1629_v11 = vsub.f32 %v1618_v17, %v1627_v23  ;;  %v1628_v26 = vmul.f32 0.015625, %v1625_v25 }
 0xe2e   : > { %v1630_v28 = vsub.f32 %v1619_v20, %v1628_v26  ;;  %v1631_v29 = vmul.f32 %v1629_v11, %v1629_v11 }
 0xe30   : > { %v1633_v12 = vsel %vm466_vm1, %v1631_v29, 0.0  ;;  %v1632_v30 = vmul.f32 %v1630_v28, %v1630_v28 }
 0xe31   : > { %1634 = vadd.xlane.f32.xlu0 %v1633_v12 }
 0xe32   : > { %v1636_v31 = vsel %vm466_vm1, %v1632_v30, 0.0 }
 0xe33   : > { %1637 = vadd.xlane.f32.xlu1 %v1636_v31 }
 0xebe   : > { %v1635_v36 = vpop.xlane.xlu0 %1634 }
 0xebf   : > { %v1639_v45 = vmul.f32 0.015625, %v1635_v36  ;;  %v1883_v36 = vrot.slane %v2921_v18, %v1882_v43 }
 0xec0   : > { %v1638_v46 = vpop.xlane.xlu1 %1637 }
 0xec1   : > { %v1641_v40 = vadd.f32 1e-05, %v1639_v45  ;;  %v1640_v47 = vmul.f32 0.015625, %v1638_v46 }
 0xec3   : > { %2473 = vrsqrt.f32 %v1641_v40  ;;  %v1642_v48 = vadd.f32 1e-05, %v1640_v47  ;;  %v1889_v40 = vrot.slane %v2921_v18, %v1888_v44 }
 0xec5   : > { %2475 = vrsqrt.f32 %v1642_v48 }
 0xecd   : > { %v2474_v52 = vpop.eup %2473 }
 0xece   : > { %v1645_v34 = vmul.f32 %v2474_v52, %v1629_v11 }
 0xecf   : > { %v2476_v53 = vpop.eup %2475 }
 0xed0   : > { %v1651_v54 = vmul.f32 %v1650_v50, %v1645_v34  ;;  %v1646_v55 = vmul.f32 %v2476_v53, %v1630_v28 }
 0xed2   : > { %v1652_v57 = vmul.f32 %v1650_v50, %v1646_v55  ;;  %v1657_v58 = vadd.f32 %v1656_v56, %v1651_v54 }
 0xed4   : > { %v1658_v59 = vadd.f32 %v1656_v56, %v1652_v57 }
 0xed6   : > { %v1659_v37 = vpack.c.bf16 %v1658_v59, %v1657_v58 }
 0xed8   : > { %2296 = vmatmul.mubr.msk.bf16.vlgmr.msra.gmra.mrb[44].mxu0 %vm466_vm1, %v1659_v37 }
 0xfab   : > { %v1733_v0 = vpop.f32.mrb[44].mxu0 }
 0xfac   : > { %v1734_v1 = vadd.f32 %v1733_v0, %v1671_v63  ;;  %v2297_v2 = vpop.f32.mrb[45].mxu0 }
 0xfad   : > { %v1736_v27 = vpop.f32.mrb[46].mxu0 }
 0xfae   : > { %v1737_v3 = vadd.f32 %v1736_v27, %v1671_v63  ;;  %v2298_v4 = vpop.f32.mrb[47].mxu0  ;;  %v1740_v5 = vmax.f32 %v1734_v1, 0.0 }
 0xfb0   : > { %v1741_v6 = vmax.f32 %v1737_v3, 0.0 }
 0xfb2   : > { %v1742_v7 = vpack.c.bf16 %v1741_v6, %v1740_v5 }
 0xfb4   : > { %2316 = vmatmul.mubr.bf16.vlgmr.msra.gmra.mrb[40].mxu1 %v1742_v7 }
0x1087   : > { %v1845_v9 = vpop.f32.mrb[40].mxu1 }
0x1088   : > { %v1846_v10 = vadd.f32 %v1845_v9, %v1762_v16  ;;  %v2317_v13 = vpop.f32.mrb[41].mxu1 }
0x1089   : > { %v1848_v14 = vpop.f32.mrb[42].mxu1 }
0x108a   : > { %v1849_v17 = vadd.f32 %v1848_v14, %v1762_v16  ;;  %v2318_v19 = vpop.f32.mrb[43].mxu1  ;;  %v1852_v20 = vadd.f32 %v1846_v10, %v1657_v58 }
0x108c   : > { %v1854_v21 = vsel %vm466_vm1, %v1852_v20, 0.0  ;;  %v1853_v22 = vadd.f32 %v1849_v17, %v1658_v59 }
0x108d   : > { %1855 = vadd.xlane.f32.xlu0 %v1854_v21 }
0x108e   : > { %v1857_v23 = vsel %vm466_vm1, %v1853_v22, 0.0 }
0x108f   : > { %1858 = vadd.xlane.f32.xlu1 %v1857_v23 }
0x111a   : > { %v1856_v25 = vpop.xlane.xlu0 %1855 }
0x111b   : > { %v1860_v11 = vmul.f32 0.015625, %v1856_v25 }
0x111c   : > { %v1859_v26 = vpop.xlane.xlu1 %1858 }
0x111d   : > { %v1862_v28 = vsub.f32 %v1852_v20, %v1860_v11  ;;  %v1861_v29 = vmul.f32 0.015625, %v1859_v26 }
0x111f   : > { %v1863_v12 = vsub.f32 %v1853_v22, %v1861_v29  ;;  %v1864_v30 = vmul.f32 %v1862_v28, %v1862_v28 }
0x1121   : > { %v1866_v31 = vsel %vm466_vm1, %v1864_v30, 0.0  ;;  %v1865_v32 = vmul.f32 %v1863_v12, %v1863_v12 }
0x1122   : > { %1867 = vadd.xlane.f32.xlu0 %v1866_v31 }
0x1123   : > { %v1869_v33 = vsel %vm466_vm1, %v1865_v32, 0.0 }
0x1124   : > { %1870 = vadd.xlane.f32.xlu1 %v1869_v33 }
0x11af   : > { %v1868_v35 = vpop.xlane.xlu0 %1867 }
0x11b0   : > { %v1872_v38 = vmul.f32 0.015625, %v1868_v35 }
0x11b1   : > { %v1871_v39 = vpop.xlane.xlu1 %1870 }
0x11b2   : > { %v1874_v41 = vadd.f32 1e-05, %v1872_v38  ;;  %v1873_v42 = vmul.f32 0.015625, %v1871_v39 }
0x11b4   : > { %2477 = vrsqrt.f32 %v1874_v41  ;;  %v1875_v24 = vadd.f32 1e-05, %v1873_v42 }
0x11b6   : > { %2479 = vrsqrt.f32 %v1875_v24 }
0x11be   : > { %v2478_v45 = vpop.eup %2477 }
0x11bf   : > { %v1878_v46 = vmul.f32 %v2478_v45, %v1862_v28 }
0x11c0   : > { %v2480_v47 = vpop.eup %2479 }
0x11c1   : > { %v1884_v48 = vmul.f32 %v1883_v36, %v1878_v46  ;;  %v1879_v49 = vmul.f32 %v2480_v47, %v1863_v12 }
0x11c3   : > { %v1885_v50 = vmul.f32 %v1883_v36, %v1879_v49  ;;  %v1890_v51 = vadd.f32 %v1889_v40, %v1884_v48 }
0x11c5   : > { %v1891_v52 = vadd.f32 %v1889_v40, %v1885_v50  ;;  %1892 = vst.msk [vmem:[#allocation8] sm:$0xff] %vm466_vm1, %v1890_v51 }
0x11c7   : > { %1893 = vst.msk [vmem:[#allocation8 + $0x8] sm:$0xff] %vm466_vm1, %v1891_v52 }
0x11c8   : > { %2582 = shalt.err (!%p2579_p9)
}
0x11c9   : > { %s2583_s13 = scalar_lea.hbm %s3206_s6, 256 }
0x11ca   : > { %p2584_p2 = scmp.ne.s32.totalorder %s3206_s6, %s2583_s13  ;;  %p2589_p10 = scmp.lt.u32.totalorder %s2583_s13, %s3206_s6 }
0x11cc   : > { %p2585_p11 = pnand %p2584_p2, %p2345_p0 }
0x11ce   : > { %p2586_p12 = pneg %p2585_p11 }
0x11d0   : > { %p2591_p8 = pnand %p2589_p10, %p2586_p12 }
0x11d2   : > { %2594 = shalt.err (!%p2591_p8)
}
0x11d3   : > { %s2673_s29 = smov 128   ;;  %s2674_s8 = smov 8  }
0x11d4   : > { %2328 = dma.vmem_to_hbm [thread:$0]  (%p2345_p0), %s1904_s10, 256, %s3206_s6, [#allocation4], %s2673_s29, %s2673_s29, %s2674_s8  }
0x11d5   : > { %2628 = dma.done.wait (%p2345_p0), [#allocation4], 256  }
0x11d6   : > { %2630 = vsyncadd (%p2345_p0), [#allocation4], 4294967040 }
0x11d7 PF: > { %s21_s26 = sadd.s32 1, %s2653_s26   ;;  %s3230_s24 = sld [smem:[#allocation12_spill]] }
0x11d8   : > { %p18_p5 = scmp.ge.s32.totalorder %s21_s26, 4   ;;  %s3231_s25 = sld [smem:[#allocation13_spill]] }
0x11d9   : > { %s3232_s21 = smov %s2637_s22  ;;  %s3233_s22 = smov %s2641_s23 }
0x11da   : > { %s3234_s23 = smov %s2754_s9  ;;  %20 = sbr.rel (!%p18_p5) target bundleno = 8 (0x8), region = 112 }
0x11e1   :  { %1919 = vsyncpa [#allocation3], 1 }
0x11e2   :  { %1921 = vsyncpa [#allocation3 + $0x1], 1 }
0x11e3   :  { %1922 = vsyncpa [#allocation6], 1 }
0x11e4   :  { %1924 = vsyncpa [#allocation6 + $0x1], 1 }
0x11e5   :  { %1925 = vsyncpa [#allocation4], 1 }
0x11e6   :  { %1927 = vsyncpa [#allocation4 + $0x1], 1 }

</bundles_post_ra>
